<compile_context>
chip_gen: v6e
topology: v6e:2x2x1
jax: 0.10.0
libtpu: 0.0.40
codegen_flags: <defaults>
</compile_context>

<pallas_src>
import jax
import jax.numpy as jnp
from jax.experimental import pallas as pl
from jax.experimental.pallas import tpu as pltpu

BN_EPS = 1e-5
LAYER_DIMS = [(6, 512), (512, 256), (256, 128), (128, 64), (64, 32), (32, 1)]
OUT_ROWS = 8          # sublane-padded row count of the transposed (1 -> 8) output head
MAX_TILE_N = 2048     # batch rows per grid step; ~8 MiB live at peak, fits every chip


def _round_up(x, m):
    return (x + m - 1) // m * m


def _choose_tile_n(n, tile_n=None):
    """Pick the batch tile.

    - multiple of 128 (keeps the transposed output block lane-dense / (8,128)-legal)
    - ~ceil(n/2) so n > 128 always yields >= 2 balanced grid steps (v7x has 2 TCs)
    - rounded to a multiple of 256 once large (feeds the 256-wide MXU cleanly)
    - capped at MAX_TILE_N to amortize the ~0.35 us per-grid-step overhead.
    """
    if tile_n is None:
        tile = _round_up(pl.cdiv(n, 2), 128)
        if tile > 256:
            tile = _round_up(tile, 256)
        tile = min(MAX_TILE_N, tile)
    else:
        tile = _round_up(tile_n, 128)
    return max(128, tile)


# ---------------------------------------------------------------------------
# Kernel
# ---------------------------------------------------------------------------
def _mlp_kernel(x_ref,
                w1, b1, w2, b2, w3, b3, w4, b4, w5, b5, w6t, b6,
                o_ref):
    """(Linear + folded-BN) -> ReLU  x5  -> Linear, for one batch tile.

    Weights are bf16 (BN folded in at wrapper time); matmuls accumulate in f32 on
    the MXU; bias add + ReLU stay in f32 on the VPU.  The final 1-wide layer is
    evaluated in transposed layout so the output block is (OUT_ROWS, tile_n):
    lane-dense over the batch, only ~4 B/row of useful data written to HBM.
    """

    def fc_relu(h_bf16, w_r, b_r):
        y = jnp.dot(h_bf16, w_r[...], preferred_element_type=jnp.float32) + b_r[...]
        return jnp.maximum(y, 0.0).astype(jnp.bfloat16)   # bf16 feed for the next MXU pass

    h = x_ref[...]                       # already bf16 (pre-cast in the wrapper)
    h = fc_relu(h, w1, b1)
    h = fc_relu(h, w2, b2)
    h = fc_relu(h, w3, b3)
    h = fc_relu(h, w4, b4)
    h = fc_relu(h, w5, b5)
    # Final Linear, transposed: (OUT_ROWS, 32) x (tile_n, 32)^T -> (OUT_ROWS, tile_n).
    # Row 0 holds the real head; rows 1..7 are zero-weight padding for sublane alignment.
    o_ref[...] = jnp.einsum('ok,nk->on', w6t[...], h,
                            preferred_element_type=jnp.float32) + b6[...]


# ---------------------------------------------------------------------------
# Parameters
# ---------------------------------------------------------------------------
def init_params(key):
    """Deterministic params mirroring nn.Linear / nn.BatchNorm1d shapes (eval mode)."""
    params = []
    for (fan_in, fan_out) in LAYER_DIMS:
        key, kw, kb = jax.random.split(key, 3)
        bound = 1.0 / jnp.sqrt(jnp.float32(fan_in))
        w = jax.random.uniform(kw, (fan_in, fan_out), jnp.float32, -bound, bound)
        b = jax.random.uniform(kb, (1, fan_out), jnp.float32, -bound, bound)
        if fan_out == 1:
            params.append((w, b))
        else:
            gamma = jnp.ones((1, fan_out), jnp.float32)
            beta = jnp.zeros((1, fan_out), jnp.float32)
            r_mean = jnp.zeros((1, fan_out), jnp.float32)
            r_var = jnp.ones((1, fan_out), jnp.float32)
            params.append((w, b, gamma, beta, r_mean, r_var))
    return params


def fold_bn_into_linear(params):
    """Fold eval-mode BatchNorm into the preceding Linear; cast weights to bf16.

    The final (32, 1) layer is stored transposed and sublane-padded to (OUT_ROWS, 32)
    (row 0 = real weights, rows 1..7 zero) so the kernel can emit a lane-dense,
    batch-major output block.
    """
    fused = []
    for (w, b, g, be, m, v) in params[:-1]:
        scale = g * jax.lax.rsqrt(v + BN_EPS)                  # (1, fan_out)
        w_f = (w * scale).astype(jnp.bfloat16)
        b_f = ((b - m) * scale + be).astype(jnp.float32)
        fused.append((w_f, b_f))
    w, b = params[-1]                                          # (32, 1), (1, 1)
    w_t = jnp.zeros((OUT_ROWS, w.shape[0]), jnp.float32).at[0, :].set(w[:, 0])
    b_t = jnp.zeros((OUT_ROWS, 1), jnp.float32).at[0, 0].set(b[0, 0])
    fused.append((w_t.astype(jnp.bfloat16), b_t))
    return fused


# ---------------------------------------------------------------------------
# Wrapper
# ---------------------------------------------------------------------------
def neural_network_forward(x, fused_params, tile_n=None):
    n, f = x.shape
    tile_n = _choose_tile_n(n, tile_n)
    n_pad = _round_up(n, tile_n)

    x_b = x.astype(jnp.bfloat16)                     # MXU-native LHS, halves input DMA
    if n_pad != n:
        x_b = jnp.pad(x_b, ((0, n_pad - n), (0, 0)))  # padded rows are sliced off below

    flat_args = [x_b]
    in_specs = [pl.BlockSpec((tile_n, f), lambda i: (i, 0))]     # pipelined batch tiles
    for w, b in fused_params:
        flat_args += [w, b]
        in_specs += [
            pl.BlockSpec(w.shape, lambda i: (0, 0)),   # constant index_map: DMA'd once,
            pl.BlockSpec(b.shape, lambda i: (0, 0)),   # VMEM-resident across the grid
        ]

    num_tiles = n_pad // tile_n
    flops = 2 * sum(fi * fo for fi, fo in LAYER_DIMS) * n_pad
    bytes_accessed = (sum(int(a.size) * a.dtype.itemsize for a in flat_args)
                      + OUT_ROWS * n_pad * 4)

    out = pl.pallas_call(
        _mlp_kernel,
        grid=(num_tiles,),
        in_specs=in_specs,
        out_specs=pl.BlockSpec((OUT_ROWS, tile_n), lambda i: (0, i)),
        out_shape=jax.ShapeDtypeStruct((OUT_ROWS, n_pad), jnp.float32),
        compiler_params=pltpu.CompilerParams(
            dimension_semantics=("parallel",),       # batch tiles across v7x's 2 TCs
            vmem_limit_bytes=32 * 1024 * 1024,       # lift v5e's 16 MiB default for big tiles
        ),
        cost_estimate=pl.CostEstimate(flops=flops, transcendentals=0,
                                      bytes_accessed=bytes_accessed),
    )(*flat_args)
    return out[0, :n][:, None]                       # (n, 1); row 0 holds the head


# ---------------------------------------------------------------------------
# References
# ---------------------------------------------------------------------------
def reference_forward_f32(x, params):
    """Pure-f32 JAX reference matching the PyTorch module (eval mode)."""
    h = x.astype(jnp.float32)
    for (w, b, g, be, m, v) in params[:-1]:
        h = h @ w + b
        h = (h - m) * jax.lax.rsqrt(v + BN_EPS) * g + be
        h = jnp.maximum(h, 0.0)
    w, b = params[-1]
    return h @ w + b


def reference_forward_matched(x, fused_params):
    """Plain-JAX reference with the same bf16-matmul / f32-accumulate math as the kernel."""
    h = x.astype(jnp.bfloat16)
    for w, b in fused_params[:-1]:
        y = jnp.dot(h, w, preferred_element_type=jnp.float32) + b
        h = jnp.maximum(y, 0.0).astype(jnp.bfloat16)
    w6t, b6 = fused_params[-1]
    y = jnp.einsum('nk,ok->no', h, w6t, preferred_element_type=jnp.float32) + b6[:, 0]
    return y[:, :1]


# ---------------------------------------------------------------------------
if __name__ == "__main__":
    key = jax.random.PRNGKey(0)
    key_p, key_x = jax.random.split(key)

    params = init_params(key_p)
    fused = fold_bn_into_linear(params)

    # batch=200 with the auto tile -> tile_n=128, n_pad=256, 2 grid steps:
    # exercises batch padding, the pipelined "parallel" grid, VMEM-resident weights
    # and the transposed lane-dense output head.
    n = 200
    x = jax.random.normal(key_x, (n, 6), dtype=jnp.float32)

    out = jax.block_until_ready(neural_network_forward(x, fused))
    assert out.shape == (n, 1), out.shape

    # Exact-math reference (same bf16/f32 mixed precision as the kernel).
    ref_matched = reference_forward_matched(x, fused)
    assert jnp.allclose(out, ref_matched, atol=2e-3, rtol=2e-3), (
        "mismatch vs matched-precision reference: "
        f"max abs diff {float(jnp.max(jnp.abs(out - ref_matched)))}")

    # Module-level reference (pure f32 Linear + BatchNorm eval + ReLU).
    ref_f32 = reference_forward_f32(x, params)
    assert jnp.allclose(out, ref_f32, atol=5e-2, rtol=5e-2), (
        "mismatch vs f32 reference: "
        f"max abs diff {float(jnp.max(jnp.abs(out - ref_f32)))}")

    print("KERNEL_OK")
</pallas_src>

<mosaic_0001>
module attributes {stable_mosaic.version = 11 : i64} {
  func.func @_mlp_kernel(%arg0: i32, %arg1: memref<128x6xbf16, #tpu.memory_space<vmem>>, %arg2: memref<6x512xbf16, #tpu.memory_space<vmem>>, %arg3: memref<1x512xf32, #tpu.memory_space<vmem>>, %arg4: memref<512x256xbf16, #tpu.memory_space<vmem>>, %arg5: memref<1x256xf32, #tpu.memory_space<vmem>>, %arg6: memref<256x128xbf16, #tpu.memory_space<vmem>>, %arg7: memref<1x128xf32, #tpu.memory_space<vmem>>, %arg8: memref<128x64xbf16, #tpu.memory_space<vmem>>, %arg9: memref<1x64xf32, #tpu.memory_space<vmem>>, %arg10: memref<64x32xbf16, #tpu.memory_space<vmem>>, %arg11: memref<1x32xf32, #tpu.memory_space<vmem>>, %arg12: memref<8x32xbf16, #tpu.memory_space<vmem>>, %arg13: memref<8x1xf32, #tpu.memory_space<vmem>>, %arg14: memref<8x128xf32, #tpu.memory_space<vmem>>) attributes {dimension_semantics = [#tpu.dimension_semantics<parallel>], iteration_bounds = array<i64: 2>, scalar_prefetch = 0 : i64, scratch_operands = 0 : i64, tpu.core_type = #tpu.core_type<tc>, window_params = [{transform_indices = @transform_0, window_bounds = array<i64: 128, 6>}, {pipeline_mode = #tpu.pipeline_mode<synchronous>, transform_indices = @transform_1, window_bounds = array<i64: 6, 512>}, {pipeline_mode = #tpu.pipeline_mode<synchronous>, transform_indices = @transform_2, window_bounds = array<i64: 1, 512>}, {pipeline_mode = #tpu.pipeline_mode<synchronous>, transform_indices = @transform_3, window_bounds = array<i64: 512, 256>}, {pipeline_mode = #tpu.pipeline_mode<synchronous>, transform_indices = @transform_4, window_bounds = array<i64: 1, 256>}, {pipeline_mode = #tpu.pipeline_mode<synchronous>, transform_indices = @transform_5, window_bounds = array<i64: 256, 128>}, {pipeline_mode = #tpu.pipeline_mode<synchronous>, transform_indices = @transform_6, window_bounds = array<i64: 1, 128>}, {pipeline_mode = #tpu.pipeline_mode<synchronous>, transform_indices = @transform_7, window_bounds = array<i64: 128, 64>}, {pipeline_mode = #tpu.pipeline_mode<synchronous>, transform_indices = @transform_8, window_bounds = array<i64: 1, 64>}, {pipeline_mode = #tpu.pipeline_mode<synchronous>, transform_indices = @transform_9, window_bounds = array<i64: 64, 32>}, {pipeline_mode = #tpu.pipeline_mode<synchronous>, transform_indices = @transform_10, window_bounds = array<i64: 1, 32>}, {pipeline_mode = #tpu.pipeline_mode<synchronous>, transform_indices = @transform_11, window_bounds = array<i64: 8, 32>}, {pipeline_mode = #tpu.pipeline_mode<synchronous>, transform_indices = @transform_12, window_bounds = array<i64: 8, 1>}, {transform_indices = @transform_13, window_bounds = array<i64: 8, 128>}]} {
    %c0 = arith.constant 0 : index
    %c0_0 = arith.constant 0 : index
    %0 = vector.load %arg1[%c0, %c0_0] : memref<128x6xbf16, #tpu.memory_space<vmem>>, vector<128x6xbf16>
    %c0_1 = arith.constant 0 : index
    %c0_2 = arith.constant 0 : index
    %1 = vector.load %arg2[%c0_1, %c0_2] : memref<6x512xbf16, #tpu.memory_space<vmem>>, vector<6x512xbf16>
    %cst = arith.constant dense<0.000000e+00> : vector<128x512xf32>
    %2 = tpu.matmul %0, %1, %cst {dimension_numbers = #tpu.dot_dimension_numbers<[1], [0], [0], [1], [0, 0, 1, 1], [], []>} : vector<128x6xbf16>, vector<6x512xbf16>, vector<128x512xf32> -> vector<128x512xf32>
    %c0_3 = arith.constant 0 : index
    %c0_4 = arith.constant 0 : index
    %3 = vector.load %arg3[%c0_3, %c0_4] : memref<1x512xf32, #tpu.memory_space<vmem>>, vector<1x512xf32>
    %4 = vector.broadcast %3 : vector<1x512xf32> to vector<128x512xf32>
    %5 = arith.addf %2, %4 : vector<128x512xf32>
    %cst_5 = arith.constant 0.000000e+00 : f32
    %6 = vector.broadcast %cst_5 : f32 to vector<128x512xf32>
    %7 = arith.maximumf %5, %6 : vector<128x512xf32>
    %8 = arith.truncf %7 : vector<128x512xf32> to vector<128x512xbf16>
    %c0_6 = arith.constant 0 : index
    %c0_7 = arith.constant 0 : index
    %9 = vector.load %arg4[%c0_6, %c0_7] : memref<512x256xbf16, #tpu.memory_space<vmem>>, vector<512x256xbf16>
    %cst_8 = arith.constant dense<0.000000e+00> : vector<128x256xf32>
    %10 = tpu.matmul %8, %9, %cst_8 {dimension_numbers = #tpu.dot_dimension_numbers<[1], [0], [0], [1], [0, 0, 1, 1], [], []>} : vector<128x512xbf16>, vector<512x256xbf16>, vector<128x256xf32> -> vector<128x256xf32>
    %c0_9 = arith.constant 0 : index
    %c0_10 = arith.constant 0 : index
    %11 = vector.load %arg5[%c0_9, %c0_10] : memref<1x256xf32, #tpu.memory_space<vmem>>, vector<1x256xf32>
    %12 = vector.broadcast %11 : vector<1x256xf32> to vector<128x256xf32>
    %13 = arith.addf %10, %12 : vector<128x256xf32>
    %cst_11 = arith.constant 0.000000e+00 : f32
    %14 = vector.broadcast %cst_11 : f32 to vector<128x256xf32>
    %15 = arith.maximumf %13, %14 : vector<128x256xf32>
    %16 = arith.truncf %15 : vector<128x256xf32> to vector<128x256xbf16>
    %c0_12 = arith.constant 0 : index
    %c0_13 = arith.constant 0 : index
    %17 = vector.load %arg6[%c0_12, %c0_13] : memref<256x128xbf16, #tpu.memory_space<vmem>>, vector<256x128xbf16>
    %cst_14 = arith.constant dense<0.000000e+00> : vector<128x128xf32>
    %18 = tpu.matmul %16, %17, %cst_14 {dimension_numbers = #tpu.dot_dimension_numbers<[1], [0], [0], [1], [0, 0, 1, 1], [], []>} : vector<128x256xbf16>, vector<256x128xbf16>, vector<128x128xf32> -> vector<128x128xf32>
    %c0_15 = arith.constant 0 : index
    %c0_16 = arith.constant 0 : index
    %19 = vector.load %arg7[%c0_15, %c0_16] : memref<1x128xf32, #tpu.memory_space<vmem>>, vector<1x128xf32>
    %20 = vector.broadcast %19 : vector<1x128xf32> to vector<128x128xf32>
    %21 = arith.addf %18, %20 : vector<128x128xf32>
    %cst_17 = arith.constant 0.000000e+00 : f32
    %22 = vector.broadcast %cst_17 : f32 to vector<128x128xf32>
    %23 = arith.maximumf %21, %22 : vector<128x128xf32>
    %24 = arith.truncf %23 : vector<128x128xf32> to vector<128x128xbf16>
    %c0_18 = arith.constant 0 : index
    %c0_19 = arith.constant 0 : index
    %25 = vector.load %arg8[%c0_18, %c0_19] : memref<128x64xbf16, #tpu.memory_space<vmem>>, vector<128x64xbf16>
    %cst_20 = arith.constant dense<0.000000e+00> : vector<128x64xf32>
    %26 = tpu.matmul %24, %25, %cst_20 {dimension_numbers = #tpu.dot_dimension_numbers<[1], [0], [0], [1], [0, 0, 1, 1], [], []>} : vector<128x128xbf16>, vector<128x64xbf16>, vector<128x64xf32> -> vector<128x64xf32>
    %c0_21 = arith.constant 0 : index
    %c0_22 = arith.constant 0 : index
    %27 = vector.load %arg9[%c0_21, %c0_22] : memref<1x64xf32, #tpu.memory_space<vmem>>, vector<1x64xf32>
    %28 = vector.broadcast %27 : vector<1x64xf32> to vector<128x64xf32>
    %29 = arith.addf %26, %28 : vector<128x64xf32>
    %cst_23 = arith.constant 0.000000e+00 : f32
    %30 = vector.broadcast %cst_23 : f32 to vector<128x64xf32>
    %31 = arith.maximumf %29, %30 : vector<128x64xf32>
    %32 = arith.truncf %31 : vector<128x64xf32> to vector<128x64xbf16>
    %c0_24 = arith.constant 0 : index
    %c0_25 = arith.constant 0 : index
    %33 = vector.load %arg10[%c0_24, %c0_25] : memref<64x32xbf16, #tpu.memory_space<vmem>>, vector<64x32xbf16>
    %cst_26 = arith.constant dense<0.000000e+00> : vector<128x32xf32>
    %34 = tpu.matmul %32, %33, %cst_26 {dimension_numbers = #tpu.dot_dimension_numbers<[1], [0], [0], [1], [0, 0, 1, 1], [], []>} : vector<128x64xbf16>, vector<64x32xbf16>, vector<128x32xf32> -> vector<128x32xf32>
    %c0_27 = arith.constant 0 : index
    %c0_28 = arith.constant 0 : index
    %35 = vector.load %arg11[%c0_27, %c0_28] : memref<1x32xf32, #tpu.memory_space<vmem>>, vector<1x32xf32>
    %36 = vector.broadcast %35 : vector<1x32xf32> to vector<128x32xf32>
    %37 = arith.addf %34, %36 : vector<128x32xf32>
    %cst_29 = arith.constant 0.000000e+00 : f32
    %38 = vector.broadcast %cst_29 : f32 to vector<128x32xf32>
    %39 = arith.maximumf %37, %38 : vector<128x32xf32>
    %40 = arith.truncf %39 : vector<128x32xf32> to vector<128x32xbf16>
    %c0_30 = arith.constant 0 : index
    %c0_31 = arith.constant 0 : index
    %41 = vector.load %arg12[%c0_30, %c0_31] : memref<8x32xbf16, #tpu.memory_space<vmem>>, vector<8x32xbf16>
    "tpu.trace_start"() <{level = 10 : i32, message = "ok,nk->on"}> : () -> ()
    %cst_32 = arith.constant dense<0.000000e+00> : vector<8x128xf32>
    %42 = tpu.matmul %41, %40, %cst_32 {dimension_numbers = #tpu.dot_dimension_numbers<[1], [1], [0], [0], [0, 0, 1, 0], [], []>} : vector<8x32xbf16>, vector<128x32xbf16>, vector<8x128xf32> -> vector<8x128xf32>
    "tpu.trace_stop"() : () -> ()
    %c0_33 = arith.constant 0 : index
    %c0_34 = arith.constant 0 : index
    %43 = vector.load %arg13[%c0_33, %c0_34] : memref<8x1xf32, #tpu.memory_space<vmem>>, vector<8x1xf32>
    %44 = vector.broadcast %43 : vector<8x1xf32> to vector<8x128xf32>
    %45 = arith.addf %42, %44 : vector<8x128xf32>
    %c0_35 = arith.constant 0 : index
    %c0_36 = arith.constant 0 : index
    %46 = vector.load %arg14[%c0_35, %c0_36] : memref<8x128xf32, #tpu.memory_space<vmem>>, vector<8x128xf32>
    tpu.vector_store %arg14[%c0_35, %c0_36], %45 {strides = array<i32>} : memref<8x128xf32, #tpu.memory_space<vmem>>, vector<8x128xf32>,
    return
  }
  func.func @transform_0(%arg0: i32) -> (i32, i32) {
    %c0_i32 = arith.constant 0 : i32
    %c0_i32_0 = arith.constant 0 : i32
    return %arg0, %c0_i32 : i32, i32
  }
  func.func @transform_1(%arg0: i32) -> (i32, i32) {
    %c0_i32 = arith.constant 0 : i32
    %c0_i32_0 = arith.constant 0 : i32
    %c0_i32_1 = arith.constant 0 : i32
    return %c0_i32, %c0_i32_0 : i32, i32
  }
  func.func @transform_2(%arg0: i32) -> (i32, i32) {
    %c0_i32 = arith.constant 0 : i32
    %c0_i32_0 = arith.constant 0 : i32
    %c0_i32_1 = arith.constant 0 : i32
    return %c0_i32, %c0_i32_0 : i32, i32
  }
  func.func @transform_3(%arg0: i32) -> (i32, i32) {
    %c0_i32 = arith.constant 0 : i32
    %c0_i32_0 = arith.constant 0 : i32
    %c0_i32_1 = arith.constant 0 : i32
    return %c0_i32, %c0_i32_0 : i32, i32
  }
  func.func @transform_4(%arg0: i32) -> (i32, i32) {
    %c0_i32 = arith.constant 0 : i32
    %c0_i32_0 = arith.constant 0 : i32
    %c0_i32_1 = arith.constant 0 : i32
    return %c0_i32, %c0_i32_0 : i32, i32
  }
  func.func @transform_5(%arg0: i32) -> (i32, i32) {
    %c0_i32 = arith.constant 0 : i32
    %c0_i32_0 = arith.constant 0 : i32
    %c0_i32_1 = arith.constant 0 : i32
    return %c0_i32, %c0_i32_0 : i32, i32
  }
  func.func @transform_6(%arg0: i32) -> (i32, i32) {
    %c0_i32 = arith.constant 0 : i32
    %c0_i32_0 = arith.constant 0 : i32
    %c0_i32_1 = arith.constant 0 : i32
    return %c0_i32, %c0_i32_0 : i32, i32
  }
  func.func @transform_7(%arg0: i32) -> (i32, i32) {
    %c0_i32 = arith.constant 0 : i32
    %c0_i32_0 = arith.constant 0 : i32
    %c0_i32_1 = arith.constant 0 : i32
    return %c0_i32, %c0_i32_0 : i32, i32
  }
  func.func @transform_8(%arg0: i32) -> (i32, i32) {
    %c0_i32 = arith.constant 0 : i32
    %c0_i32_0 = arith.constant 0 : i32
    %c0_i32_1 = arith.constant 0 : i32
    return %c0_i32, %c0_i32_0 : i32, i32
  }
  func.func @transform_9(%arg0: i32) -> (i32, i32) {
    %c0_i32 = arith.constant 0 : i32
    %c0_i32_0 = arith.constant 0 : i32
    %c0_i32_1 = arith.constant 0 : i32
    return %c0_i32, %c0_i32_0 : i32, i32
  }
  func.func @transform_10(%arg0: i32) -> (i32, i32) {
    %c0_i32 = arith.constant 0 : i32
    %c0_i32_0 = arith.constant 0 : i32
    %c0_i32_1 = arith.constant 0 : i32
    return %c0_i32, %c0_i32_0 : i32, i32
  }
  func.func @transform_11(%arg0: i32) -> (i32, i32) {
    %c0_i32 = arith.constant 0 : i32
    %c0_i32_0 = arith.constant 0 : i32
    %c0_i32_1 = arith.constant 0 : i32
    return %c0_i32, %c0_i32_0 : i32, i32
  }
  func.func @transform_12(%arg0: i32) -> (i32, i32) {
    %c0_i32 = arith.constant 0 : i32
    %c0_i32_0 = arith.constant 0 : i32
    %c0_i32_1 = arith.constant 0 : i32
    return %c0_i32, %c0_i32_0 : i32, i32
  }
  func.func @transform_13(%arg0: i32) -> (i32, i32) {
    %c0_i32 = arith.constant 0 : i32
    %c0_i32_0 = arith.constant 0 : i32
    return %c0_i32, %arg0 : i32, i32
  }
}

</mosaic_0001>

<bundles_post_ra>
// kernel: tpu_custom_call.1
= control target key start
LH: loop header
LB: loop body
LE: loop exit
PB: predicated region body
PF: predicated region fallthrough
CT: control target
= control target key end

     0   :  { %s3516_s0 = inlined_call_operand.vmem [shape: bf16[256,6], index: 0, kind: input, shape index: {}]   ;;  %s3517_s1 = inlined_call_operand.vmem [shape: bf16[6,512], index: 1, kind: input, shape index: {}]   ;;  %s3518_s2 = inlined_call_operand.vmem [shape: f32[1,512], index: 2, kind: input, shape index: {}]   ;;  %s3519_s3 = inlined_call_operand.hbm [shape: bf16[512,256], index: 3, kind: input, shape index: {}]   ;;  %s3520_s4 = inlined_call_operand.vmem [shape: f32[1,256], index: 4, kind: input, shape index: {}]   ;;  %s3521_s5 = inlined_call_operand.vmem [shape: bf16[256,128], index: 5, kind: input, shape index: {}]   ;;  %s3522_s6 = inlined_call_operand.vmem [shape: f32[1,128], index: 6, kind: input, shape index: {}]   ;;  %s3523_s7 = inlined_call_operand.vmem [shape: bf16[128,64], index: 7, kind: input, shape index: {}]   ;;  %s3524_s8 = inlined_call_operand.vmem [shape: f32[1,64], index: 8, kind: input, shape index: {}]   ;;  %s3525_s9 = inlined_call_operand.vmem [shape: bf16[64,32], index: 9, kind: input, shape index: {}]   ;;  %s3526_s10 = inlined_call_operand.vmem [shape: f32[1,32], index: 10, kind: input, shape index: {}]   ;;  %s3527_s11 = inlined_call_operand.vmem [shape: bf16[8,32], index: 11, kind: input, shape index: {}]   ;;  %s3528_s12 = inlined_call_operand.vmem [shape: f32[8,1], index: 12, kind: input, shape index: {}]   ;;  %s3529_s13 = inlined_call_operand.hbm [shape: f32[8,256], index: 13, kind: output, shape index: {}]  }
   0x1   :  { %3530 = sst [smem:[#allocation8_spill]] %s3516_s0 }
   0x2   :  { %3531 = sst [smem:[#allocation9_spill]] %s3517_s1 }
   0x3   :  { %3532 = sst [smem:[#allocation10_spill]] %s3519_s3 }
   0x4   :  { %18 = vsyncpa [#allocation3], 0 }
   0x5   :  { %19 = vsyncpa [#allocation4], 0 }
   0x6   :  { %21 = vsyncpa [#allocation4 + $0x1], 0  ;;  %s3056_s25 = smov 0   ;;  %s3058_s26 = smov 0  }
   0x7   :  { %s3060_s27 = smov 0   ;;  %s3062_s28 = smov 0  }
   0x8 LB: > { %s3077_s29 = sadd.s32 4294967295, %s2977_s28   ;;  %s2371_s30 = sadd.s32 4294967294, %s2977_s28   ;;  %s2977_s28 = sphi %s3062_s28, %s3543_s28   ;;  %s2973_s27 = sphi %s3060_s27, %s3542_s27   ;;  %s2969_s26 = sphi %s3058_s26, %s3541_s26   ;;  %s2965_s25 = sphi %s3056_s25, %s3540_s25  }
   0x9   : > { %s3081_s14 = sadd.s32 1, %s2977_s28   ;;  %s312_s15 = sadd.s32 1, %s2973_s27 }
   0xa   : > { %s309_s16 = ssub.s32 %s2977_s28, %s3081_s14  ;;  %p322_p0 = scmp.ne.s32.totalorder %s2973_s27, %s2969_s26 }
   0xb   : > { %p310_p1 = scmp.eq.s32.totalorder %s309_s16, 0  ;;  %p323_p2 = scmp.eq.s32.totalorder %s3077_s29, 1 }
   0xc   : > { %p328_p3 = scmp.ne.s32.totalorder %s2969_s26, %s2965_s25  ;;  %p329_p4 = scmp.eq.s32.totalorder %s2371_s30, 1 }
   0xd   : > { %s3092_s17 = scalar_select %p310_p1, %s2973_s27, %s312_s15  }
   0xe   : > { %p3094_p5 = por %p323_p2, %p322_p0  ;;  %p3098_p6 = por %p329_p4, %p328_p3 }
   0xf   : > { %p2372_p7 = scmp.ge.s32.totalorder %s2977_s28, 1  ;;  %p336_p8 = scmp.lt.s32.totalorder %s2977_s28, 3 }
  0x10   : > { %s3534_s19 = scalar_select %p3098_p6, 1, 0 }
  0x11   : > { %p2709_p9 = scmp.eq.s32.totalorder %s3077_s29, 0  ;;  %p3105_p10 = pnand %p2372_p7, %p336_p8 }
  0x12   : > { %s2979_s21 = smov [#allocation2]  }
  0x13   : > { %s354_s22 = sshll.u32 %s2979_s21, 4  ;;  %p2701_p11 = pneg %p3105_p10  ;;  %s355_s22 = int_to_ptr.vmem [resolvable:$true] %s354_s22 }
  0x14   : > { %s2898_s23 = scalar_lea.vmem %s355_s22, 8192  ;;  %p2906_p3 = scmp.lt.s32.totalorder %s355_s22, %s355_s22 }
  0x15   : > { %p2702_p12 = pnand %p2709_p9, %p2701_p11  ;;  %p2899_p0 = scmp.ne.s32.totalorder %s355_s22, %s2898_s23 }
  0x16   : > { %p2907_p4 = scmp.lt.s32.totalorder %s2898_s23, %s2898_s23 }
  0x17   : > { %p2889_p13 = pneg %p2702_p12 }
  0x18   : > { %p2908_p6 = por %p2907_p4, %p2906_p3 }
  0x19   : > { %p2901_p1 = pnand %p2899_p0, %p2889_p13 }
  0x1b   : > { %p2902_p2 = pneg %p2901_p1 }
  0x1d   : > { %p2909_p7 = pnand %p2908_p6, %p2902_p2 }
  0x1f   : > { %2912 = shalt.err (!%p2909_p7)
}
  0x20   : > { %s2980_s24 = smov 128   ;;  %s2981_s30 = smov 8  }
  0x21   : > { %s3536_s3 = sld [smem:[#allocation10_spill]] }
  0x23   : > { %406 = sbr.rel (%p3105_p10) target bundleno = 1414 (0x586), region = 72 }
  0x27   : > { %2704 = dma.hbm_to_vmem [thread:$0]  (!%p2702_p12), %s3536_s3, 8192, %s355_s22, [#allocation3], %s2980_s24, %s2980_s24, %s2981_s30  }
  0x28   : > { %2956 = dma.done.wait (%p2709_p9), [#allocation3], 8192  }
  0x29   : > { %2958 = vsyncadd (%p2709_p9), [#allocation3], 4294959104  ;;  %s2378_s21 = sshll.u32 %s3077_s29, 4  ;;  %v2982_v0 = vmov 0   ;;  %vm572_vm0 = vcmask 1042432   ;;  %s3537_s0 = sld [smem:[#allocation8_spill]] }
  0x2a   : > { %617 = vmatprep.mubr.bf16.mxu0 %v2982_v0  ;;  %730 = vmatprep.mubr.bf16.mxu1 %v2982_v0  ;;  %p451_p6 = scmp.lt.s32.totalorder %s2378_s21, 31  ;;  %s3538_s1 = sld [smem:[#allocation9_spill]]  ;;  %vm547_vm1 = vcmask 48128   ;;  %v2763_v11 = vld [vmem:[#allocation2 + $0x70] ss:$8 sps:$4 sm:$0xff]   ;;  %vm2064_vm2 = vcmask 523264  }
  0x2b   : > { %2750 = vset.pattern.permute.xlu0 %v2982_v0  ;;  %v2765_v12 = vld [vmem:[#allocation2 + $0x74] ss:$8 sps:$4 sm:$0xff]   ;;  %v2766_v13 = vld [vmem:[#allocation2 + $0x170] ss:$8 sps:$4 sm:$0xff]   ;;  %v2771_v15 = vld [vmem:[#allocation2 + $0x64] ss:$8 sps:$4 sm:$0xff]  }
  0x2c   : > { %s3545_s21 = smov (!%p451_p6, %s2378_s21), 31  ;;  %v2768_v14 = vld [vmem:[#allocation2 + $0x174] ss:$8 sps:$4 sm:$0xff]   ;;  %v2769_v16 = vld [vmem:[#allocation2 + $0x60] ss:$8 sps:$4 sm:$0xff]   ;;  %vm2984_vm3 = vmmov 0  }
  0x2d   : > { %s2379_s22 = sshll.u32 %s3545_s21, 2  ;;  %v2774_v17 = vld [vmem:[#allocation2 + $0x164] ss:$8 sps:$4 sm:$0xff]   ;;  %v2772_v18 = vld [vmem:[#allocation2 + $0x160] ss:$8 sps:$4 sm:$0xff]   ;;  %vm2217_vm4 = vcmask 261120  }
  0x2e   : > { %v2777_v19 = vld [vmem:[#allocation2 + $0x54] ss:$8 sps:$4 sm:$0xff]   ;;  %v2775_v21 = vld [vmem:[#allocation2 + $0x50] ss:$8 sps:$4 sm:$0xff]   ;;  %v2783_v23 = vld [vmem:[#allocation2 + $0x44] ss:$8 sps:$4 sm:$0xff]  }
  0x2f   : > { %s3129_s24 = scalar_lea.vmem %s3537_s0, %s2379_s22  ;;  %v2780_v20 = vld [vmem:[#allocation2 + $0x154] ss:$8 sps:$4 sm:$0xff]   ;;  %v2778_v22 = vld [vmem:[#allocation2 + $0x150] ss:$8 sps:$4 sm:$0xff]   ;;  %v2781_v25 = vld [vmem:[#allocation2 + $0x40] ss:$8 sps:$4 sm:$0xff]  }
  0x30   : > { %v473_v1 = vld [vmem:[%s3538_s1] sm:$0x77]  ;;  %v474_v2 = vld [vmem:[%s3538_s1 + $0x8] sm:$0x77]  ;;  %v2757_v24 = vld [vmem:[%s3129_s24 + $0x10] sm:$0xff]   ;;  %s447_s20 = sand.u32 1, %s2969_s26  }
  0x31   : > { %v2389_v3 = vcombine.high %v473_v1, %v473_v1  ;;  %v2391_v4 = vcombine.high %v474_v2, %v474_v2  ;;  %v2388_v5 = vcombine.low %v473_v1, %v473_v1  ;;  %v2390_v6 = vcombine.low %v474_v2, %v474_v2  ;;  %v2755_v9 = vld [vmem:[%s3129_s24] sm:$0xff]   ;;  %v2756_v10 = vld [vmem:[%s3129_s24 + $0x8] sm:$0xff]   ;;  %v2789_v28 = vld [vmem:[#allocation2 + $0x34] ss:$8 sps:$4 sm:$0xff]   ;;  %s2377_s23 = sshll.u32 %s447_s20, 3  ;;  %s2515_s0 = sshll.u32 %s3077_s29, 7 }
  0x32   : > { %v2784_v26 = vld [vmem:[#allocation2 + $0x140] ss:$8 sps:$4 sm:$0xff]   ;;  %v2786_v27 = vld [vmem:[#allocation2 + $0x144] ss:$8 sps:$4 sm:$0xff]   ;;  %v2792_v29 = vld [vmem:[#allocation2 + $0x134] ss:$8 sps:$4 sm:$0xff]   ;;  %s3475_s3 = scalar_lea.hbm %s3529_s13, %s2515_s0 }
  0x33   : > { %2392 = vmatprep.subr.msk.bf16.mxu0 %vm572_vm0, %v2389_v3  ;;  %2401 = vmatprep.subr.msk.bf16.mxu1 %vm572_vm0, %v2391_v4  ;;  %v574_v7 = vsel %vm572_vm0, %v2388_v5, 0  ;;  %v580_v8 = vsel %vm572_vm0, %v2390_v6, 0  ;;  %v2787_v30 = vld [vmem:[#allocation2 + $0x30] ss:$8 sps:$4 sm:$0xff]   ;;  %v2795_v32 = vld [vmem:[#allocation2 + $0x24] ss:$8 sps:$4 sm:$0xff]  }
  0x34   : > { %600 = vmatpush1.bf16.msra.mxu0 %v574_v7  ;;  %713 = vmatpush1.bf16.msra.mxu1 %v580_v8  ;;  %v2790_v31 = vld [vmem:[#allocation2 + $0x130] ss:$8 sps:$4 sm:$0xff]   ;;  %v2793_v34 = vld [vmem:[#allocation2 + $0x20] ss:$8 sps:$4 sm:$0xff]   ;;  %v2798_v36 = vld [vmem:[#allocation2 + $0x124] ss:$8 sps:$4 sm:$0xff]  }
  0x35   : > { %1303 = vmatprep.subr.bf16.mxu0 %v2765_v12  ;;  %1416 = vmatprep.subr.bf16.mxu1 %v2768_v14  ;;  %v2758_v33 = vld [vmem:[%s3129_s24 + $0x18] sm:$0xff]   ;;  %v2796_v35 = vld [vmem:[#allocation2 + $0x120] ss:$8 sps:$4 sm:$0xff]   ;;  %v2807_v41 = vld [vmem:[#allocation2 + $0x4] ss:$8 sps:$4 sm:$0xff]   ;;  %s2287_s21 = scalar_lea.sflag [#allocation4], %s447_s20 }
  0x36   : > { %v2801_v37 = vld [vmem:[#allocation2 + $0x14] ss:$8 sps:$4 sm:$0xff]   ;;  %v2799_v39 = vld [vmem:[#allocation2 + $0x10] ss:$8 sps:$4 sm:$0xff]   ;;  %v2759_v42 = vld [vmem:[%s3129_s24 + $0x20] sm:$0xff]   ;;  %s2985_s29 = smov [#allocation5]  }
  0x37   : > { %2393 = vmatmul.mubr.msk.bf16.vlgmr.msra.gmra.mxu0 %vm547_vm1, %v2755_v9  ;;  %2402 = vmatmul.mubr.msk.bf16.vlgmr.msra.gmra.mxu1 %vm547_vm1, %v2755_v9  ;;  %v2804_v38 = vld [vmem:[#allocation2 + $0x114] ss:$8 sps:$4 sm:$0xff]   ;;  %v2802_v40 = vld [vmem:[#allocation2 + $0x110] ss:$8 sps:$4 sm:$0xff]   ;;  %v2805_v43 = vld [vmem:[#allocation2] ss:$8 sps:$4 sm:$0xff]  }
  0x38   : > { %627 = vmatprep.mubr.bf16.mxu0 %v2982_v0  ;;  %740 = vmatprep.mubr.bf16.mxu1 %v2982_v0  ;;  %v2808_v44 = vld [vmem:[#allocation2 + $0x100] ss:$8 sps:$4 sm:$0xff]   ;;  %v2810_v45 = vld [vmem:[#allocation2 + $0x104] ss:$8 sps:$4 sm:$0xff]   ;;  %v2813_v46 = vld [vmem:[#allocation2 + $0xf4] ss:$8 sps:$4 sm:$0xff]  }
  0x39   : > { %1304 = vmatpush1.bf16.msra.mxu0 %v2763_v11  ;;  %1417 = vmatpush1.bf16.msra.mxu1 %v2766_v13  ;;  %v2816_v47 = vld [vmem:[#allocation2 + $0x1f4] ss:$8 sps:$4 sm:$0xff]   ;;  %v2760_v48 = vld [vmem:[%s3129_s24 + $0x28] sm:$0xff]   ;;  %v2811_v49 = vld [vmem:[#allocation2 + $0xf0] ss:$8 sps:$4 sm:$0xff]  }
  0x3a   : > { %1305 = vmatprep.subr.bf16.mxu0 %v2771_v15  ;;  %1418 = vmatprep.subr.bf16.mxu1 %v2774_v17  ;;  %v2814_v50 = vld [vmem:[#allocation2 + $0x1f0] ss:$8 sps:$4 sm:$0xff]   ;;  %v2819_v51 = vld [vmem:[#allocation2 + $0xe4] ss:$8 sps:$4 sm:$0xff]   ;;  %v2817_v52 = vld [vmem:[#allocation2 + $0xe0] ss:$8 sps:$4 sm:$0xff]  }
  0x3b   : > { %v2822_v53 = vld [vmem:[#allocation2 + $0x1e4] ss:$8 sps:$4 sm:$0xff]   ;;  %v2820_v54 = vld [vmem:[#allocation2 + $0x1e0] ss:$8 sps:$4 sm:$0xff]   ;;  %v2825_v55 = vld [vmem:[#allocation2 + $0xd4] ss:$8 sps:$4 sm:$0xff]  }
  0x3c   : > { %v2828_v56 = vld [vmem:[#allocation2 + $0x1d4] ss:$8 sps:$4 sm:$0xff]   ;;  %v2823_v57 = vld [vmem:[#allocation2 + $0xd0] ss:$8 sps:$4 sm:$0xff]   ;;  %v2831_v59 = vld [vmem:[#allocation2 + $0xc4] ss:$8 sps:$4 sm:$0xff]  }
  0x3d   : > { %1306 = vmatpush1.bf16.msra.mxu0 %v2769_v16  ;;  %1419 = vmatpush1.bf16.msra.mxu1 %v2772_v18  ;;  %v2826_v58 = vld [vmem:[#allocation2 + $0x1d0] ss:$8 sps:$4 sm:$0xff]   ;;  %v2829_v61 = vld [vmem:[#allocation2 + $0xc0] ss:$8 sps:$4 sm:$0xff]   ;;  %v2834_v62 = vld [vmem:[#allocation2 + $0x1c4] ss:$8 sps:$4 sm:$0xff]   ;;  %v477_v18 = vlaneseq }
  0x3e   : > { %1307 = vmatprep.subr.bf16.mxu0 %v2777_v19  ;;  %1420 = vmatprep.subr.bf16.mxu1 %v2780_v20  ;;  %v2761_v60 = vld [vmem:[%s3129_s24 + $0x30] sm:$0xff]   ;;  %v2832_v63 = vld [vmem:[#allocation2 + $0x1c0] ss:$8 sps:$4 sm:$0xff]   ;;  %v2762_v5 = vld [vmem:[%s3129_s24 + $0x38] sm:$0xff]   ;;  %s449_s24 = scalar_lea.vmem [#allocation5], %s2377_s23  ;;  %s2917_s23 = sshll.u32 %s2985_s29, 4  ;;  %s2918_s23 = int_to_ptr.vmem [resolvable:$false] %s2917_s23 }
  0x3f   : > { %2394 = vmatmul.mubr.msk.bf16.gmra.mxu0 %vm547_vm1, %v2756_v10  ;;  %2403 = vmatmul.mubr.msk.bf16.gmra.mxu1 %vm547_vm1, %v2756_v10  ;;  %v2837_v1 = vld [vmem:[#allocation2 + $0xb4] ss:$8 sps:$4 sm:$0xff]   ;;  %v2835_v3 = vld [vmem:[#allocation2 + $0xb0] ss:$8 sps:$4 sm:$0xff]   ;;  %v2843_v6 = vld [vmem:[#allocation2 + $0xa4] ss:$8 sps:$4 sm:$0xff]  }
  0x40   : > { %637 = vmatprep.mubr.bf16.mxu0 %v2982_v0  ;;  %750 = vmatprep.mubr.bf16.mxu1 %v2982_v0  ;;  %v2840_v2 = vld [vmem:[#allocation2 + $0x1b4] ss:$8 sps:$4 sm:$0xff]   ;;  %v2838_v4 = vld [vmem:[#allocation2 + $0x1b0] ss:$8 sps:$4 sm:$0xff]   ;;  %v2846_v7 = vld [vmem:[#allocation2 + $0x1a4] ss:$8 sps:$4 sm:$0xff]  }
  0x41   : > { %1308 = vmatpush1.bf16.msra.mxu0 %v2775_v21  ;;  %1421 = vmatpush1.bf16.msra.mxu1 %v2778_v22  ;;  %v2841_v8 = vld [vmem:[#allocation2 + $0xa0] ss:$8 sps:$4 sm:$0xff]   ;;  %v2852_v10 = vld [vmem:[#allocation2 + $0x194] ss:$8 sps:$4 sm:$0xff]   ;;  %v2847_v11 = vld [vmem:[#allocation2 + $0x90] ss:$8 sps:$4 sm:$0xff]  }
  0x42   : > { %1309 = vmatprep.subr.bf16.mxu0 %v2783_v23  ;;  %1422 = vmatprep.subr.bf16.mxu1 %v2786_v27  ;;  %v2844_v9 = vld [vmem:[#allocation2 + $0x1a0] ss:$8 sps:$4 sm:$0xff]   ;;  %v2850_v12 = vld [vmem:[#allocation2 + $0x190] ss:$8 sps:$4 sm:$0xff]   ;;  %v2855_v13 = vld [vmem:[#allocation2 + $0x84] ss:$8 sps:$4 sm:$0xff]  }
  0x43   : > { %v2858_v14 = vld [vmem:[#allocation2 + $0x184] ss:$8 sps:$4 sm:$0xff]   ;;  %v2853_v15 = vld [vmem:[#allocation2 + $0x80] ss:$8 sps:$4 sm:$0xff]   ;;  %v2859_v17 = vld [vmem:[%s3521_s5 + $0x78] sm:$0xff]   ;;  %v3178_v19 = vshrl.u32 %v477_v18, 7 }
  0x44   : > { %v2856_v16 = vld [vmem:[#allocation2 + $0x180] ss:$8 sps:$4 sm:$0xff]   ;;  %s2300_s30 = sshll.u32 %s449_s24, 4  ;;  %s2919_s15 = scalar_lea.vmem %s2918_s23, 256  ;;  %s3477_s30 = int_to_ptr.vmem [resolvable:$true] %s2300_s30 }
  0x45   : > { %1310 = vmatpush1.bf16.msra.mxu0 %v2781_v25  ;;  %1423 = vmatpush1.bf16.msra.mxu1 %v2784_v26  ;;  %v483_v20 = vsub.s32 1, %v3178_v19  ;;  %v491_v21 = vsub.s32 3, %v3178_v19  ;;  %v479_v22 = vsub.s32 0, %v3178_v19  ;;  %v487_v23 = vsub.s32 2, %v3178_v19  ;;  %s2913_s22 = scalar_lea.vmem %s3477_s30, 128  ;;  %p2920_p11 = scmp.lt.s32.totalorder %s3477_s30, %s2918_s23 }
  0x46   : > { %1311 = vmatprep.subr.bf16.mxu0 %v2789_v28  ;;  %1424 = vmatprep.subr.bf16.mxu1 %v2792_v29  ;;  %p2914_p8 = scmp.ne.s32.totalorder %s3477_s30, %s2913_s22  ;;  %p2921_p12 = scmp.lt.s32.totalorder %s2919_s15, %s2913_s22 }
  0x47   : > { %2395 = vmatmul.mubr.msk.bf16.gmra.mxu0 %vm547_vm1, %v2757_v24  ;;  %2404 = vmatmul.mubr.msk.bf16.gmra.mxu1 %vm547_vm1, %v2757_v24  ;;  %v475_v24 = vld [vmem:[%s3518_s2] sm:$0xf] }
  0x48   : > { %647 = vmatprep.mubr.bf16.mxu0 %v2982_v0  ;;  %760 = vmatprep.mubr.bf16.mxu1 %v2982_v0  ;;  %v3189_v27 = vrot.slane %v475_v24, %v483_v20  ;;  %v3191_v28 = vrot.slane %v475_v24, %v491_v21  ;;  %v3195_v29 = vrot.slane %v475_v24, %v479_v22  ;;  %p2915_p9 = pnand %p2914_p8, %p3094_p5  ;;  %p2922_p13 = por %p2921_p12, %p2920_p11 }
  0x49   : > { %1312 = vmatpush1.bf16.msra.mxu0 %v2787_v30  ;;  %1425 = vmatpush1.bf16.msra.mxu1 %v2790_v31  ;;  %v3197_v30 = vrot.slane %v475_v24, %v487_v23 }
  0x4a   : > { %1313 = vmatprep.subr.bf16.mxu0 %v2795_v32  ;;  %1426 = vmatprep.subr.bf16.mxu1 %v2798_v36  ;;  %p2916_p10 = pneg %p2915_p9 }
  0x4c   : > { %p2923_p0 = pnand %p2922_p13, %p2916_p10 }
  0x4d   : > { %1314 = vmatpush1.bf16.msra.mxu0 %v2793_v34  ;;  %1427 = vmatpush1.bf16.msra.mxu1 %v2796_v35 }
  0x4e   : > { %1315 = vmatprep.subr.bf16.mxu0 %v2801_v37  ;;  %1428 = vmatprep.subr.bf16.mxu1 %v2804_v38 }
  0x4f   : > { %2396 = vmatmul.mubr.msk.bf16.gmra.mxu0 %vm547_vm1, %v2758_v33  ;;  %2405 = vmatmul.mubr.msk.bf16.gmra.mxu1 %vm547_vm1, %v2758_v33 }
  0x50   : > { %657 = vmatprep.mubr.bf16.mxu0 %v2982_v0  ;;  %770 = vmatprep.mubr.bf16.mxu1 %v2982_v0 }
  0x51   : > { %1316 = vmatpush1.bf16.msra.mxu0 %v2799_v39  ;;  %1429 = vmatpush1.bf16.msra.mxu1 %v2802_v40 }
  0x52   : > { %1317 = vmatprep.subr.bf16.mxu0 %v2807_v41  ;;  %1430 = vmatprep.subr.bf16.mxu1 %v2810_v45 }
  0x55   : > { %1318 = vmatpush1.bf16.msra.mxu0 %v2805_v43  ;;  %1431 = vmatpush1.bf16.msra.mxu1 %v2808_v44 }
  0x56   : > { %1319 = vmatprep.subr.bf16.mxu0 %v2813_v46  ;;  %1432 = vmatprep.subr.bf16.mxu1 %v2816_v47 }
  0x57   : > { %2397 = vmatmul.mubr.msk.bf16.gmra.mxu0 %vm547_vm1, %v2759_v42  ;;  %2406 = vmatmul.mubr.msk.bf16.gmra.mxu1 %vm547_vm1, %v2759_v42 }
  0x58   : > { %667 = vmatprep.mubr.bf16.mxu0 %v2982_v0  ;;  %780 = vmatprep.mubr.bf16.mxu1 %v2982_v0 }
  0x59   : > { %1320 = vmatpush2.bf16.msra.mxu0 %v2811_v49  ;;  %1433 = vmatpush2.bf16.msra.mxu1 %v2814_v50 }
  0x5a   : > { %1321 = vmatprep.subr.bf16.mxu0 %v2819_v51  ;;  %1434 = vmatprep.subr.bf16.mxu1 %v2822_v53 }
  0x5d   : > { %1322 = vmatpush2.bf16.msra.mxu0 %v2817_v52  ;;  %1435 = vmatpush2.bf16.msra.mxu1 %v2820_v54 }
  0x5e   : > { %1323 = vmatprep.subr.bf16.mxu0 %v2825_v55  ;;  %1436 = vmatprep.subr.bf16.mxu1 %v2828_v56 }
  0x5f   : > { %2398 = vmatmul.mubr.msk.bf16.gmra.mxu0 %vm547_vm1, %v2760_v48  ;;  %2407 = vmatmul.mubr.msk.bf16.gmra.mxu1 %vm547_vm1, %v2760_v48 }
  0x60   : > { %677 = vmatprep.mubr.bf16.mxu0 %v2982_v0  ;;  %790 = vmatprep.mubr.bf16.mxu1 %v2982_v0 }
  0x61   : > { %1324 = vmatpush2.bf16.msra.mxu0 %v2823_v57  ;;  %1437 = vmatpush2.bf16.msra.mxu1 %v2826_v58 }
  0x62   : > { %1325 = vmatprep.subr.bf16.mxu0 %v2831_v59  ;;  %1438 = vmatprep.subr.bf16.mxu1 %v2834_v62  ;;  %v2860_v59 = vld [vmem:[%s3521_s5 + $0x38] sm:$0xff]  }
  0x65   : > { %1326 = vmatpush2.bf16.msra.mxu0 %v2829_v61  ;;  %1439 = vmatpush2.bf16.msra.mxu1 %v2832_v63 }
  0x66   : > { %1327 = vmatprep.subr.bf16.mxu0 %v2837_v1  ;;  %1440 = vmatprep.subr.bf16.mxu1 %v2840_v2  ;;  %v2861_v2 = vld [vmem:[%s3521_s5 + $0x70] sm:$0xff]  }
  0x67   : > { %2399 = vmatmul.mubr.msk.bf16.gmra.mxu0 %vm547_vm1, %v2761_v60  ;;  %2408 = vmatmul.mubr.msk.bf16.gmra.mxu1 %vm547_vm1, %v2761_v60 }
  0x68   : > { %687 = vmatprep.mubr.bf16.mxu0 %v2982_v0  ;;  %800 = vmatprep.mubr.bf16.mxu1 %v2982_v0  ;;  %v2849_v0 = vld [vmem:[#allocation2 + $0x94] ss:$8 sps:$4 sm:$0xff]  }
  0x69   : > { %1328 = vmatpush2.bf16.msra.mxu0 %v2835_v3  ;;  %1441 = vmatpush2.bf16.msra.mxu1 %v2838_v4 }
  0x6a   : > { %1329 = vmatprep.subr.bf16.mxu0 %v2843_v6  ;;  %1442 = vmatprep.subr.bf16.mxu1 %v2846_v7 }
  0x6d   : > { %1330 = vmatpush2.bf16.msra.mxu0 %v2841_v8  ;;  %1443 = vmatpush2.bf16.msra.mxu1 %v2844_v9 }
  0x6e   : > { %1331 = vmatprep.subr.bf16.mxu0 %v2849_v0  ;;  %1444 = vmatprep.subr.bf16.mxu1 %v2852_v10 }
  0x6f   : > { %2400 = vmatmul.mubr.msk.bf16.gmra.mxu0 %vm547_vm1, %v2762_v5  ;;  %2409 = vmatmul.mubr.msk.bf16.gmra.mxu1 %vm547_vm1, %v2762_v5 }
  0x71   : > { %1332 = vmatpush2.bf16.msra.mxu0 %v2847_v11  ;;  %1445 = vmatpush2.bf16.msra.mxu1 %v2850_v12  ;;  %v2862_v11 = vld [vmem:[%s3521_s5 + $0x30] sm:$0xff]  }
  0x72   : > { %1333 = vmatprep.subr.bf16.mxu0 %v2855_v13  ;;  %1446 = vmatprep.subr.bf16.mxu1 %v2858_v14 }
  0x75   : > { %1334 = vmatpush2.bf16.msra.mxu0 %v2853_v15  ;;  %1447 = vmatpush2.bf16.msra.mxu1 %v2856_v16  ;;  %v2863_v16 = vld [vmem:[%s3521_s5 + $0x68] sm:$0xff]  }
  0x76   : > { %2518 = vmatprep.subr.bf16.mxu0 %v2859_v17 }
  0xf7   : > { %v619_v25 = vpop.f32.mrf.mxu0  ;;  %v732_v26 = vpop.f32.mrf.mxu1 }
  0xf8   : > { %v620_v39 = vadd.f32 %v619_v25, %v3195_v29  ;;  %v733_v40 = vadd.f32 %v732_v26, %v3197_v30 }
  0xf9   : > { %v621_v31 = vpop.f32.mrf.mxu0  ;;  %v734_v32 = vpop.f32.mrf.mxu1 }
  0xfa   : > { %v622_v35 = vadd.f32 %v621_v31, %v3189_v27  ;;  %v735_v36 = vadd.f32 %v734_v32, %v3191_v28  ;;  %v811_v53 = vmax.f32 %v620_v39, 0.0  ;;  %v813_v54 = vmax.f32 %v733_v40, 0.0  ;;  %v2865_v40 = vld [vmem:[%s3521_s5 + $0x60] sm:$0xff]  }
  0xfb   : > { %v623_v33 = vpop.f32.mrf.mxu0  ;;  %v736_v34 = vpop.f32.mrf.mxu1 }
  0xfc   : > { %v624_v37 = vadd.f32 %v623_v33, %v3195_v29  ;;  %v737_v38 = vadd.f32 %v736_v34, %v3197_v30  ;;  %v812_v49 = vmax.f32 %v622_v35, 0.0  ;;  %v814_v50 = vmax.f32 %v735_v36, 0.0  ;;  %v2864_v34 = vld [vmem:[%s3521_s5 + $0x28] sm:$0xff]  }
  0xfd   : > { %v625_v41 = vpop.f32.mrf.mxu0  ;;  %v738_v42 = vpop.f32.mrf.mxu1 }
  0xfe   : > { %v626_v43 = vadd.f32 %v625_v41, %v3189_v27  ;;  %v739_v44 = vadd.f32 %v738_v42, %v3191_v28  ;;  %v815_v45 = vmax.f32 %v624_v37, 0.0  ;;  %v817_v46 = vmax.f32 %v737_v38, 0.0 }
  0xff   : > { %v629_v47 = vpop.f32.mrf.mxu0  ;;  %v742_v48 = vpop.f32.mrf.mxu1 }
 0x100   : > { %v816_v51 = vmax.f32 %v626_v43, 0.0  ;;  %v818_v52 = vmax.f32 %v739_v44, 0.0  ;;  %v875_v60 = vpack.c.bf16 %v815_v45, %v811_v53  ;;  %v877_v61 = vpack.c.bf16 %v817_v46, %v813_v54 }
 0x101   : > { %v631_v55 = vpop.f32.mrf.mxu0  ;;  %v744_v56 = vpop.f32.mrf.mxu1  ;;  %v630_v6 = vadd.f32 %v629_v47, %v3195_v29  ;;  %v743_v7 = vadd.f32 %v742_v48, %v3197_v30 }
 0x102   : > { %v876_v57 = vpack.c.bf16 %v816_v51, %v812_v49  ;;  %v878_v58 = vpack.c.bf16 %v818_v52, %v814_v50  ;;  %v632_v62 = vadd.f32 %v631_v55, %v3189_v27  ;;  %v745_v3 = vadd.f32 %v744_v56, %v3191_v28  ;;  %v2866_v50 = vld [vmem:[%s3521_s5 + $0x20] sm:$0xff]   ;;  %v2867_v55 = vld [vmem:[%s3521_s5 + $0x58] sm:$0xff]  }
 0x103   : > { %v633_v63 = vpop.f32.mrf.mxu0  ;;  %v746_v1 = vpop.f32.mrf.mxu1  ;;  %v819_v24 = vmax.f32 %v630_v6, 0.0  ;;  %v821_v25 = vmax.f32 %v743_v7, 0.0 }
 0x104   : > { %v634_v4 = vadd.f32 %v633_v63, %v3195_v29  ;;  %v747_v5 = vadd.f32 %v746_v1, %v3197_v30  ;;  %1335 = vmatprep.mubr.bf16.mxu0 %v876_v57  ;;  %1448 = vmatprep.mubr.bf16.mxu1 %v878_v58  ;;  %v820_v17 = vmax.f32 %v632_v62, 0.0  ;;  %v822_v18 = vmax.f32 %v745_v3, 0.0  ;;  %v2868_v3 = vld [vmem:[%s3521_s5 + $0x18] sm:$0xff]  }
 0x105   : > { %v635_v8 = vpop.f32.mrf.mxu0  ;;  %v748_v9 = vpop.f32.mrf.mxu1  ;;  %1336 = vmatmul.mubr.bf16.vlgmr.msra.gmra.mxu0 %v875_v60  ;;  %1449 = vmatmul.mubr.bf16.vlgmr.msra.gmra.mxu1 %v877_v61 }
 0x106   : > { %v636_v0 = vadd.f32 %v635_v8, %v3189_v27  ;;  %v749_v10 = vadd.f32 %v748_v9, %v3191_v28  ;;  %2519 = vmatpush3.bf16.msra.mxu0 %v2860_v59  ;;  %v823_v12 = vmax.f32 %v634_v4, 0.0  ;;  %v825_v13 = vmax.f32 %v747_v5, 0.0  ;;  %v2869_v9 = vld [vmem:[%s3521_s5 + $0x50] sm:$0xff]  }
 0x107   : > { %v639_v14 = vpop.f32.mrf.mxu0  ;;  %v752_v15 = vpop.f32.mrf.mxu1  ;;  %2520 = vmatprep.subr.bf16.mxu0 %v2861_v2 }
 0x108   : > { %v824_v21 = vmax.f32 %v636_v0, 0.0  ;;  %v826_v23 = vmax.f32 %v749_v10, 0.0  ;;  %v879_v35 = vpack.c.bf16 %v823_v12, %v819_v24  ;;  %v881_v36 = vpack.c.bf16 %v825_v13, %v821_v25 }
 0x109   : > { %v641_v26 = vpop.f32.mrf.mxu0  ;;  %v754_v31 = vpop.f32.mrf.mxu1  ;;  %v640_v44 = vadd.f32 %v639_v14, %v3195_v29  ;;  %v753_v45 = vadd.f32 %v752_v15, %v3197_v30 }
 0x10a   : > { %v880_v32 = vpack.c.bf16 %v824_v21, %v820_v17  ;;  %v882_v33 = vpack.c.bf16 %v826_v23, %v822_v18  ;;  %2521 = vmatpush3.bf16.msra.mxu0 %v2862_v11  ;;  %v642_v37 = vadd.f32 %v641_v26, %v3189_v27  ;;  %v755_v41 = vadd.f32 %v754_v31, %v3191_v28  ;;  %v2870_v18 = vld [vmem:[%s3521_s5 + $0x10] sm:$0xff]  }
 0x10b   : > { %v643_v38 = vpop.f32.mrf.mxu0  ;;  %v756_v39 = vpop.f32.mrf.mxu1  ;;  %2522 = vmatprep.subr.bf16.mxu0 %v2863_v16  ;;  %v827_v60 = vmax.f32 %v640_v44, 0.0  ;;  %v829_v61 = vmax.f32 %v753_v45, 0.0 }
 0x10c   : > { %v644_v42 = vadd.f32 %v643_v38, %v3195_v29  ;;  %v757_v43 = vadd.f32 %v756_v39, %v3197_v30  ;;  %1345 = vmatprep.mubr.bf16.mxu0 %v880_v32  ;;  %1458 = vmatprep.mubr.bf16.mxu1 %v882_v33  ;;  %v828_v56 = vmax.f32 %v642_v37, 0.0  ;;  %v830_v57 = vmax.f32 %v755_v41, 0.0 }
 0x10d   : > { %v645_v46 = vpop.f32.mrf.mxu0  ;;  %v758_v47 = vpop.f32.mrf.mxu1  ;;  %1346 = vmatmul.mubr.bf16.gmra.mxu0 %v879_v35  ;;  %1459 = vmatmul.mubr.bf16.gmra.mxu1 %v881_v36 }
 0x10e   : > { %v646_v48 = vadd.f32 %v645_v46, %v3189_v27  ;;  %v759_v49 = vadd.f32 %v758_v47, %v3191_v28  ;;  %2523 = vmatpush3.bf16.msra.mxu0 %v2864_v34  ;;  %v831_v51 = vmax.f32 %v644_v42, 0.0  ;;  %v833_v52 = vmax.f32 %v757_v43, 0.0 }
 0x10f   : > { %v649_v53 = vpop.f32.mrf.mxu0  ;;  %v762_v54 = vpop.f32.mrf.mxu1  ;;  %2524 = vmatprep.subr.bf16.mxu0 %v2865_v40 }
 0x110   : > { %v832_v58 = vmax.f32 %v646_v48, 0.0  ;;  %v834_v59 = vmax.f32 %v759_v49, 0.0  ;;  %v883_v4 = vpack.c.bf16 %v831_v51, %v827_v60  ;;  %v885_v5 = vpack.c.bf16 %v833_v52, %v829_v61 }
 0x111   : > { %v651_v62 = vpop.f32.mrf.mxu0  ;;  %v764_v63 = vpop.f32.mrf.mxu1  ;;  %v650_v12 = vadd.f32 %v649_v53, %v3195_v29  ;;  %v763_v13 = vadd.f32 %v762_v54, %v3197_v30 }
 0x112   : > { %v884_v1 = vpack.c.bf16 %v832_v58, %v828_v56  ;;  %v886_v2 = vpack.c.bf16 %v834_v59, %v830_v57  ;;  %2525 = vmatpush3.bf16.msra.mxu0 %v2866_v50  ;;  %v652_v6 = vadd.f32 %v651_v62, %v3189_v27  ;;  %v765_v0 = vadd.f32 %v764_v63, %v3191_v28 }
 0x113   : > { %v653_v7 = vpop.f32.mrf.mxu0  ;;  %v766_v8 = vpop.f32.mrf.mxu1  ;;  %2526 = vmatprep.subr.bf16.mxu0 %v2867_v55  ;;  %v835_v34 = vmax.f32 %v650_v12, 0.0  ;;  %v837_v35 = vmax.f32 %v763_v13, 0.0 }
 0x114   : > { %v654_v10 = vadd.f32 %v653_v7, %v3195_v29  ;;  %v767_v11 = vadd.f32 %v766_v8, %v3197_v30  ;;  %1355 = vmatprep.mubr.bf16.mxu0 %v884_v1  ;;  %1468 = vmatprep.mubr.bf16.mxu1 %v886_v2  ;;  %v836_v26 = vmax.f32 %v652_v6, 0.0  ;;  %v838_v31 = vmax.f32 %v765_v0, 0.0 }
 0x115   : > { %v655_v14 = vpop.f32.mrf.mxu0  ;;  %v768_v15 = vpop.f32.mrf.mxu1  ;;  %1356 = vmatmul.mubr.bf16.gmra.mxu0 %v883_v4  ;;  %1469 = vmatmul.mubr.bf16.gmra.mxu1 %v885_v5 }
 0x116   : > { %v656_v16 = vadd.f32 %v655_v14, %v3189_v27  ;;  %v769_v17 = vadd.f32 %v768_v15, %v3191_v28  ;;  %2527 = vmatpush3.bf16.msra.mxu0 %v2868_v3  ;;  %v839_v21 = vmax.f32 %v654_v10, 0.0  ;;  %v841_v23 = vmax.f32 %v767_v11, 0.0 }
 0x117   : > { %v659_v24 = vpop.f32.mrf.mxu0  ;;  %v772_v25 = vpop.f32.mrf.mxu1  ;;  %2528 = vmatprep.subr.bf16.mxu0 %v2869_v9 }
 0x118   : > { %v840_v32 = vmax.f32 %v656_v16, 0.0  ;;  %v842_v33 = vmax.f32 %v769_v17, 0.0  ;;  %v887_v40 = vpack.c.bf16 %v839_v21, %v835_v34  ;;  %v889_v41 = vpack.c.bf16 %v841_v23, %v837_v35 }
 0x119   : > { %v661_v36 = vpop.f32.mrf.mxu0  ;;  %v774_v37 = vpop.f32.mrf.mxu1  ;;  %v660_v48 = vadd.f32 %v659_v24, %v3195_v29  ;;  %v773_v49 = vadd.f32 %v772_v25, %v3197_v30 }
 0x11a   : > { %v888_v38 = vpack.c.bf16 %v840_v32, %v836_v26  ;;  %v890_v39 = vpack.c.bf16 %v842_v33, %v838_v31  ;;  %2529 = vmatpush3.bf16.msra.mxu0 %v2870_v18  ;;  %v662_v42 = vadd.f32 %v661_v36, %v3189_v27  ;;  %v775_v45 = vadd.f32 %v774_v37, %v3191_v28 }
 0x11b   : > { %v663_v43 = vpop.f32.mrf.mxu0  ;;  %v776_v44 = vpop.f32.mrf.mxu1  ;;  %v843_v62 = vmax.f32 %v660_v48, 0.0  ;;  %v845_v63 = vmax.f32 %v773_v49, 0.0 }
 0x11c   : > { %v664_v46 = vadd.f32 %v663_v43, %v3195_v29  ;;  %v777_v47 = vadd.f32 %v776_v44, %v3197_v30  ;;  %1365 = vmatprep.mubr.bf16.mxu0 %v888_v38  ;;  %1478 = vmatprep.mubr.bf16.mxu1 %v890_v39  ;;  %v844_v58 = vmax.f32 %v662_v42, 0.0  ;;  %v846_v59 = vmax.f32 %v775_v45, 0.0 }
 0x11d   : > { %v665_v50 = vpop.f32.mrf.mxu0  ;;  %v778_v51 = vpop.f32.mrf.mxu1  ;;  %1366 = vmatmul.mubr.bf16.gmra.mxu0 %v887_v40  ;;  %1479 = vmatmul.mubr.bf16.gmra.mxu1 %v889_v41 }
 0x11e   : > { %v666_v52 = vadd.f32 %v665_v50, %v3189_v27  ;;  %v779_v53 = vadd.f32 %v778_v51, %v3191_v28  ;;  %v847_v54 = vmax.f32 %v664_v46, 0.0  ;;  %v849_v55 = vmax.f32 %v777_v47, 0.0 }
 0x11f   : > { %v669_v56 = vpop.f32.mrf.mxu0  ;;  %v782_v57 = vpop.f32.mrf.mxu1 }
 0x120   : > { %v848_v60 = vmax.f32 %v666_v52, 0.0  ;;  %v850_v61 = vmax.f32 %v779_v53, 0.0  ;;  %v891_v5 = vpack.c.bf16 %v847_v54, %v843_v62  ;;  %v893_v6 = vpack.c.bf16 %v849_v55, %v845_v63 }
 0x121   : > { %v671_v1 = vpop.f32.mrf.mxu0  ;;  %v784_v2 = vpop.f32.mrf.mxu1  ;;  %v670_v12 = vadd.f32 %v669_v56, %v3195_v29  ;;  %v783_v13 = vadd.f32 %v782_v57, %v3197_v30 }
 0x122   : > { %v892_v3 = vpack.c.bf16 %v848_v60, %v844_v58  ;;  %v894_v4 = vpack.c.bf16 %v850_v61, %v846_v59  ;;  %v672_v7 = vadd.f32 %v671_v1, %v3189_v27  ;;  %v785_v0 = vadd.f32 %v784_v2, %v3191_v28 }
 0x123   : > { %v673_v8 = vpop.f32.mrf.mxu0  ;;  %v786_v9 = vpop.f32.mrf.mxu1  ;;  %v851_v33 = vmax.f32 %v670_v12, 0.0  ;;  %v853_v34 = vmax.f32 %v783_v13, 0.0 }
 0x124   : > { %v674_v10 = vadd.f32 %v673_v8, %v3195_v29  ;;  %v787_v11 = vadd.f32 %v786_v9, %v3197_v30  ;;  %1375 = vmatprep.mubr.bf16.mxu0 %v892_v3  ;;  %1488 = vmatprep.mubr.bf16.mxu1 %v894_v4  ;;  %v852_v25 = vmax.f32 %v672_v7, 0.0  ;;  %v854_v26 = vmax.f32 %v785_v0, 0.0 }
 0x125   : > { %v675_v14 = vpop.f32.mrf.mxu0  ;;  %v788_v15 = vpop.f32.mrf.mxu1  ;;  %1376 = vmatmul.mubr.bf16.gmra.mxu0 %v891_v5  ;;  %1489 = vmatmul.mubr.bf16.gmra.mxu1 %v893_v6 }
 0x126   : > { %v676_v16 = vadd.f32 %v675_v14, %v3189_v27  ;;  %v789_v17 = vadd.f32 %v788_v15, %v3191_v28  ;;  %v855_v18 = vmax.f32 %v674_v10, 0.0  ;;  %v857_v21 = vmax.f32 %v787_v11, 0.0 }
 0x127   : > { %v679_v23 = vpop.f32.mrf.mxu0  ;;  %v792_v24 = vpop.f32.mrf.mxu1 }
 0x128   : > { %v856_v31 = vmax.f32 %v676_v16, 0.0  ;;  %v858_v32 = vmax.f32 %v789_v17, 0.0  ;;  %v895_v39 = vpack.c.bf16 %v855_v18, %v851_v33  ;;  %v897_v40 = vpack.c.bf16 %v857_v21, %v853_v34  ;;  %v2873_v34 = vld [vmem:[%s3521_s5 + $0x40] sm:$0xff]  }
 0x129   : > { %v681_v35 = vpop.f32.mrf.mxu0  ;;  %v794_v36 = vpop.f32.mrf.mxu1  ;;  %v680_v47 = vadd.f32 %v679_v23, %v3195_v29  ;;  %v793_v48 = vadd.f32 %v792_v24, %v3197_v30 }
 0x12a   : > { %v896_v37 = vpack.c.bf16 %v856_v31, %v852_v25  ;;  %v898_v38 = vpack.c.bf16 %v858_v32, %v854_v26  ;;  %v682_v41 = vadd.f32 %v681_v35, %v3189_v27  ;;  %v795_v44 = vadd.f32 %v794_v36, %v3191_v28  ;;  %v2874_v35 = vld [vmem:[%s3521_s5] sm:$0xff]   ;;  %v2875_v36 = vld [vmem:[%s3523_s7 + $0x38] sm:$0xff]  }
 0x12b   : > { %v683_v42 = vpop.f32.mrf.mxu0  ;;  %v796_v43 = vpop.f32.mrf.mxu1  ;;  %v859_v61 = vmax.f32 %v680_v47, 0.0  ;;  %v861_v62 = vmax.f32 %v793_v48, 0.0  ;;  %2619 = vmatprep.subr.bf16.mxu1 %v2875_v36 }
 0x12c   : > { %v684_v45 = vadd.f32 %v683_v42, %v3195_v29  ;;  %v797_v46 = vadd.f32 %v796_v43, %v3197_v30  ;;  %1385 = vmatprep.mubr.bf16.mxu0 %v896_v37  ;;  %1498 = vmatprep.mubr.bf16.mxu1 %v898_v38  ;;  %v860_v57 = vmax.f32 %v682_v41, 0.0  ;;  %v862_v58 = vmax.f32 %v795_v44, 0.0  ;;  %v2876_v37 = vld [vmem:[%s3523_s7 + $0x30] sm:$0xff]   ;;  %v2877_v38 = vld [vmem:[%s3523_s7 + $0x28] sm:$0xff]  }
 0x12d   : > { %v685_v49 = vpop.f32.mrf.mxu0  ;;  %v798_v50 = vpop.f32.mrf.mxu1  ;;  %1386 = vmatmul.mubr.bf16.gmra.mxu0 %v895_v39  ;;  %1499 = vmatmul.mubr.bf16.gmra.mxu1 %v897_v40  ;;  %v971_v39 = vld [vmem:[%s3520_s4] sm:$0x3] }
 0x12e   : > { %v686_v51 = vadd.f32 %v685_v49, %v3189_v27  ;;  %v799_v52 = vadd.f32 %v798_v50, %v3191_v28  ;;  %v863_v53 = vmax.f32 %v684_v45, 0.0  ;;  %v865_v54 = vmax.f32 %v797_v46, 0.0  ;;  %2620 = vmatpush3.bf16.msra.mxu1 %v2875_v36 }
 0x12f   : > { %v689_v55 = vpop.f32.mrf.mxu0  ;;  %v802_v56 = vpop.f32.mrf.mxu1  ;;  %2621 = vmatprep.subr.bf16.mxu1 %v2876_v37  ;;  %v3322_v40 = vrot.slane %v971_v39, %v483_v20  ;;  %v3326_v41 = vrot.slane %v971_v39, %v479_v22 }
 0x130   : > { %v864_v59 = vmax.f32 %v686_v51, 0.0  ;;  %v866_v60 = vmax.f32 %v799_v52, 0.0  ;;  %v899_v4 = vpack.c.bf16 %v863_v53, %v859_v61  ;;  %v901_v5 = vpack.c.bf16 %v865_v54, %v861_v62 }
 0x131   : > { %v691_v63 = vpop.f32.mrf.mxu0  ;;  %v804_v1 = vpop.f32.mrf.mxu1  ;;  %v690_v11 = vadd.f32 %v689_v55, %v3195_v29  ;;  %v803_v12 = vadd.f32 %v802_v56, %v3197_v30 }
 0x132   : > { %v900_v2 = vpack.c.bf16 %v864_v59, %v860_v57  ;;  %v902_v3 = vpack.c.bf16 %v866_v60, %v862_v58  ;;  %v692_v6 = vadd.f32 %v691_v63, %v3189_v27  ;;  %v805_v9 = vadd.f32 %v804_v1, %v3191_v28  ;;  %2622 = vmatpush3.bf16.msra.mxu1 %v2876_v37 }
 0x133   : > { %v693_v7 = vpop.f32.mrf.mxu0  ;;  %v806_v8 = vpop.f32.mrf.mxu1  ;;  %v867_v26 = vmax.f32 %v690_v11, 0.0  ;;  %v869_v31 = vmax.f32 %v803_v12, 0.0  ;;  %2623 = vmatprep.subr.bf16.mxu1 %v2877_v38 }
 0x134   : > { %v694_v0 = vadd.f32 %v693_v7, %v3195_v29  ;;  %v807_v10 = vadd.f32 %v806_v8, %v3197_v30  ;;  %1395 = vmatprep.mubr.bf16.mxu0 %v900_v2  ;;  %1508 = vmatprep.mubr.bf16.mxu1 %v902_v3  ;;  %v868_v21 = vmax.f32 %v692_v6, 0.0  ;;  %v870_v23 = vmax.f32 %v805_v9, 0.0 }
 0x135   : > { %v695_v13 = vpop.f32.mrf.mxu0  ;;  %v808_v14 = vpop.f32.mrf.mxu1  ;;  %1396 = vmatmul.mubr.bf16.gmra.mxu0 %v899_v4  ;;  %1509 = vmatmul.mubr.bf16.gmra.mxu1 %v901_v5 }
 0x136   : > { %v696_v15 = vadd.f32 %v695_v13, %v3189_v27  ;;  %v809_v16 = vadd.f32 %v808_v14, %v3191_v28  ;;  %v871_v17 = vmax.f32 %v694_v0, 0.0  ;;  %v873_v18 = vmax.f32 %v807_v10, 0.0  ;;  %v2871_v27 = vld [vmem:[%s3521_s5 + $0x48] sm:$0xff]   ;;  %2624 = vmatpush3.bf16.msra.mxu1 %v2877_v38 }
 0x137   : > { %v2872_v28 = vld [vmem:[%s3521_s5 + $0x8] sm:$0xff]   ;;  %2530 = vmatprep.subr.bf16.mxu0 %v2871_v27 }
 0x138   : > { %v872_v24 = vmax.f32 %v696_v15, 0.0  ;;  %v874_v25 = vmax.f32 %v809_v16, 0.0  ;;  %v903_v33 = vpack.c.bf16 %v871_v17, %v867_v26  ;;  %v905_v30 = vpack.c.bf16 %v873_v18, %v869_v31  ;;  %2531 = vmatpush3.bf16.msra.mxu0 %v2872_v28 }
 0x139   : > { %2532 = vmatprep.subr.bf16.mxu0 %v2873_v34 }
 0x13a   : > { %v904_v32 = vpack.c.bf16 %v872_v24, %v868_v21  ;;  %v906_v29 = vpack.c.bf16 %v874_v25, %v870_v23 }
 0x13c   : > { %1405 = vmatprep.mubr.bf16.mxu0 %v904_v32  ;;  %1518 = vmatprep.mubr.bf16.mxu1 %v906_v29 }
 0x13d   : > { %1406 = vmatmul.mubr.bf16.gmra.mxu0 %v903_v33  ;;  %1519 = vmatmul.mubr.bf16.gmra.mxu1 %v905_v30 }
 0x13e   : > { %2533 = vmatpush3.bf16.msra.mxu0 %v2874_v35 }
 0x1c5   : > { %v1337_v42 = vpop.f32.mrf.mxu0  ;;  %v1450_v43 = vpop.f32.mrf.mxu1 }
 0x1c6   : > { %v1338_v47 = vadd.f32 %v1337_v42, %v3326_v41 }
 0x1c7   : > { %v1339_v44 = vpop.f32.mrf.mxu0  ;;  %v1452_v45 = vpop.f32.mrf.mxu1 }
 0x1c8   : > { %v1340_v46 = vadd.f32 %v1339_v44, %v3322_v40  ;;  %v1451_v22 = vadd.f32 %v1450_v43, %v1338_v47 }
 0x1c9   : > { %v1341_v48 = vpop.f32.mrf.mxu0  ;;  %v1454_v49 = vpop.f32.mrf.mxu1 }
 0x1ca   : > { %v1342_v50 = vadd.f32 %v1341_v48, %v3326_v41  ;;  %v1453_v20 = vadd.f32 %v1452_v45, %v1340_v46  ;;  %v1529_v63 = vmax.f32 %v1451_v22, 0.0 }
 0x1cb   : > { %v1343_v51 = vpop.f32.mrf.mxu0  ;;  %v1456_v52 = vpop.f32.mrf.mxu1 }
 0x1cc   : > { %v1455_v53 = vadd.f32 %v1454_v49, %v1342_v50  ;;  %v1344_v19 = vadd.f32 %v1343_v51, %v3322_v40  ;;  %v1530_v60 = vmax.f32 %v1453_v20, 0.0 }
 0x1cd   : > { %v1347_v54 = vpop.f32.mrf.mxu0  ;;  %v1460_v55 = vpop.f32.mrf.mxu1 }
 0x1ce   : > { %v1457_v56 = vadd.f32 %v1456_v52, %v1344_v19  ;;  %v1531_v57 = vmax.f32 %v1455_v53, 0.0  ;;  %v1348_v1 = vadd.f32 %v1347_v54, %v3326_v41 }
 0x1cf   : > { %v1349_v58 = vpop.f32.mrf.mxu0  ;;  %v1462_v59 = vpop.f32.mrf.mxu1 }
 0x1d0   : > { %v1532_v61 = vmax.f32 %v1457_v56, 0.0  ;;  %v1350_v62 = vadd.f32 %v1349_v58, %v3322_v40  ;;  %v1561_v6 = vpack.c.bf16 %v1531_v57, %v1529_v63  ;;  %v1461_v11 = vadd.f32 %v1460_v55, %v1348_v1 }
 0x1d1   : > { %v1351_v2 = vpop.f32.mrf.mxu0  ;;  %v1464_v3 = vpop.f32.mrf.mxu1 }
 0x1d2   : > { %v1562_v4 = vpack.c.bf16 %v1532_v61, %v1530_v60  ;;  %v1352_v5 = vadd.f32 %v1351_v2, %v3326_v41  ;;  %v1463_v9 = vadd.f32 %v1462_v59, %v1350_v62  ;;  %v1533_v24 = vmax.f32 %v1461_v11, 0.0 }
 0x1d3   : > { %v1353_v7 = vpop.f32.mrf.mxu0  ;;  %v1466_v8 = vpop.f32.mrf.mxu1 }
 0x1d4   : > { %v1465_v0 = vadd.f32 %v1464_v3, %v1352_v5  ;;  %v1354_v10 = vadd.f32 %v1353_v7, %v3322_v40  ;;  %1744 = vmatprep.mubr.bf16.mxu0 %v1562_v4  ;;  %v1534_v18 = vmax.f32 %v1463_v9, 0.0 }
 0x1d5   : > { %v1357_v12 = vpop.f32.mrf.mxu0  ;;  %v1470_v13 = vpop.f32.mrf.mxu1  ;;  %1745 = vmatmul.mubr.bf16.vlgmr.msra.gmra.mxu0 %v1561_v6 }
 0x1d6   : > { %v1467_v14 = vadd.f32 %v1466_v8, %v1354_v10  ;;  %v1535_v15 = vmax.f32 %v1465_v0, 0.0  ;;  %v1358_v25 = vadd.f32 %v1357_v12, %v3326_v41 }
 0x1d7   : > { %v1359_v16 = vpop.f32.mrf.mxu0  ;;  %v1472_v17 = vpop.f32.mrf.mxu1 }
 0x1d8   : > { %v1536_v21 = vmax.f32 %v1467_v14, 0.0  ;;  %v1360_v23 = vadd.f32 %v1359_v16, %v3322_v40  ;;  %v1563_v33 = vpack.c.bf16 %v1535_v15, %v1533_v24  ;;  %v1471_v36 = vadd.f32 %v1470_v13, %v1358_v25 }
 0x1d9   : > { %v1361_v26 = vpop.f32.mrf.mxu0  ;;  %v1474_v31 = vpop.f32.mrf.mxu1 }
 0x1da   : > { %v1564_v32 = vpack.c.bf16 %v1536_v21, %v1534_v18  ;;  %v1362_v29 = vadd.f32 %v1361_v26, %v3326_v41  ;;  %v1473_v28 = vadd.f32 %v1472_v17, %v1360_v23  ;;  %v1537_v48 = vmax.f32 %v1471_v36, 0.0 }
 0x1db   : > { %v1363_v30 = vpop.f32.mrf.mxu0  ;;  %v1476_v27 = vpop.f32.mrf.mxu1 }
 0x1dc   : > { %v1475_v34 = vadd.f32 %v1474_v31, %v1362_v29  ;;  %v1364_v35 = vadd.f32 %v1363_v30, %v3322_v40  ;;  %1752 = vmatprep.mubr.bf16.mxu0 %v1564_v32  ;;  %v1538_v45 = vmax.f32 %v1473_v28, 0.0 }
 0x1dd   : > { %v1367_v37 = vpop.f32.mrf.mxu0  ;;  %v1480_v38 = vpop.f32.mrf.mxu1  ;;  %1753 = vmatmul.mubr.bf16.gmra.mxu0 %v1563_v33 }
 0x1de   : > { %v1477_v39 = vadd.f32 %v1476_v27, %v1364_v35  ;;  %v1539_v42 = vmax.f32 %v1475_v34, 0.0  ;;  %v1368_v49 = vadd.f32 %v1367_v37, %v3326_v41 }
 0x1df   : > { %v1369_v43 = vpop.f32.mrf.mxu0  ;;  %v1482_v44 = vpop.f32.mrf.mxu1 }
 0x1e0   : > { %v1540_v46 = vmax.f32 %v1477_v39, 0.0  ;;  %v1370_v47 = vadd.f32 %v1369_v43, %v3322_v40  ;;  %v1565_v53 = vpack.c.bf16 %v1539_v42, %v1537_v48  ;;  %v1481_v57 = vadd.f32 %v1480_v38, %v1368_v49 }
 0x1e1   : > { %v1371_v50 = vpop.f32.mrf.mxu0  ;;  %v1484_v51 = vpop.f32.mrf.mxu1 }
 0x1e2   : > { %v1566_v52 = vpack.c.bf16 %v1540_v46, %v1538_v45  ;;  %v1372_v20 = vadd.f32 %v1371_v50, %v3326_v41  ;;  %v1483_v54 = vadd.f32 %v1482_v44, %v1370_v47  ;;  %v1541_v4 = vmax.f32 %v1481_v57, 0.0 }
 0x1e3   : > { %v1373_v19 = vpop.f32.mrf.mxu0  ;;  %v1486_v22 = vpop.f32.mrf.mxu1 }
 0x1e4   : > { %v1485_v55 = vadd.f32 %v1484_v51, %v1372_v20  ;;  %v1374_v56 = vadd.f32 %v1373_v19, %v3322_v40  ;;  %1760 = vmatprep.mubr.bf16.mxu0 %v1566_v52  ;;  %v1542_v1 = vmax.f32 %v1483_v54, 0.0 }
 0x1e5   : > { %v1377_v58 = vpop.f32.mrf.mxu0  ;;  %v1490_v59 = vpop.f32.mrf.mxu1  ;;  %1761 = vmatmul.mubr.bf16.gmra.mxu0 %v1565_v53 }
 0x1e6   : > { %v1487_v60 = vadd.f32 %v1486_v22, %v1374_v56  ;;  %v1543_v61 = vmax.f32 %v1485_v55, 0.0  ;;  %v1378_v5 = vadd.f32 %v1377_v58, %v3326_v41 }
 0x1e7   : > { %v1379_v62 = vpop.f32.mrf.mxu0  ;;  %v1492_v63 = vpop.f32.mrf.mxu1 }
 0x1e8   : > { %v1544_v2 = vmax.f32 %v1487_v60, 0.0  ;;  %v1380_v3 = vadd.f32 %v1379_v62, %v3322_v40  ;;  %v1567_v0 = vpack.c.bf16 %v1543_v61, %v1541_v4  ;;  %v1491_v15 = vadd.f32 %v1490_v59, %v1378_v5 }
 0x1e9   : > { %v1381_v6 = vpop.f32.mrf.mxu0  ;;  %v1494_v7 = vpop.f32.mrf.mxu1 }
 0x1ea   : > { %v1568_v8 = vpack.c.bf16 %v1544_v2, %v1542_v1  ;;  %v1382_v9 = vadd.f32 %v1381_v6, %v3326_v41  ;;  %v1493_v12 = vadd.f32 %v1492_v63, %v1380_v3  ;;  %v1545_v32 = vmax.f32 %v1491_v15, 0.0 }
 0x1eb   : > { %v1383_v10 = vpop.f32.mrf.mxu0  ;;  %v1496_v11 = vpop.f32.mrf.mxu1 }
 0x1ec   : > { %v1495_v13 = vadd.f32 %v1494_v7, %v1382_v9  ;;  %v1384_v14 = vadd.f32 %v1383_v10, %v3322_v40  ;;  %1768 = vmatprep.mubr.bf16.mxu0 %v1568_v8  ;;  %v1546_v25 = vmax.f32 %v1493_v12, 0.0 }
 0x1ed   : > { %v1387_v16 = vpop.f32.mrf.mxu0  ;;  %v1500_v17 = vpop.f32.mrf.mxu1  ;;  %1769 = vmatmul.mubr.bf16.gmra.mxu0 %v1567_v0 }
 0x1ee   : > { %v1497_v18 = vadd.f32 %v1496_v11, %v1384_v14  ;;  %v1547_v21 = vmax.f32 %v1495_v13, 0.0  ;;  %v1388_v29 = vadd.f32 %v1387_v16, %v3326_v41 }
 0x1ef   : > { %v1389_v23 = vpop.f32.mrf.mxu0  ;;  %v1502_v24 = vpop.f32.mrf.mxu1 }
 0x1f0   : > { %v1548_v26 = vmax.f32 %v1497_v18, 0.0  ;;  %v1390_v31 = vadd.f32 %v1389_v23, %v3322_v40  ;;  %v1569_v34 = vpack.c.bf16 %v1547_v21, %v1545_v32  ;;  %v1501_v42 = vadd.f32 %v1500_v17, %v1388_v29 }
 0x1f1   : > { %v1391_v33 = vpop.f32.mrf.mxu0  ;;  %v1504_v30 = vpop.f32.mrf.mxu1 }
 0x1f2   : > { %v1570_v27 = vpack.c.bf16 %v1548_v26, %v1546_v25  ;;  %v1392_v28 = vadd.f32 %v1391_v33, %v3326_v41  ;;  %v1503_v37 = vadd.f32 %v1502_v24, %v1390_v31  ;;  %v1549_v52 = vmax.f32 %v1501_v42, 0.0  ;;  %v2880_v33 = vld [vmem:[%s3523_s7 + $0x10] sm:$0xff]  }
 0x1f3   : > { %v1393_v35 = vpop.f32.mrf.mxu0  ;;  %v1506_v36 = vpop.f32.mrf.mxu1 }
 0x1f4   : > { %v1505_v38 = vadd.f32 %v1504_v30, %v1392_v28  ;;  %v1394_v39 = vadd.f32 %v1393_v35, %v3322_v40  ;;  %1776 = vmatprep.mubr.bf16.mxu0 %v1570_v27  ;;  %v1550_v49 = vmax.f32 %v1503_v37, 0.0  ;;  %v2881_v30 = vld [vmem:[%s3523_s7 + $0x8] sm:$0xff]   ;;  %v2882_v27 = vld [vmem:[%s3523_s7] sm:$0xff]   ;;  %v2883_v28 = vld [vmem:[%s3525_s9 + $0x18] sm:$0xff]  }
 0x1f5   : > { %v1397_v43 = vpop.f32.mrf.mxu0  ;;  %v1510_v44 = vpop.f32.mrf.mxu1  ;;  %1777 = vmatmul.mubr.bf16.gmra.mxu0 %v1569_v34  ;;  %v3381_v37 = vld [vmem:[%s3522_s6] ss:$0 sm:$0xff] }
 0x1f6   : > { %v1507_v45 = vadd.f32 %v1506_v36, %v1394_v39  ;;  %v1551_v46 = vmax.f32 %v1505_v38, 0.0  ;;  %v1398_v20 = vadd.f32 %v1397_v43, %v3326_v41 }
 0x1f7   : > { %v1399_v47 = vpop.f32.mrf.mxu0  ;;  %v1512_v48 = vpop.f32.mrf.mxu1 }
 0x1f8   : > { %v1552_v50 = vmax.f32 %v1507_v45, 0.0  ;;  %v1400_v51 = vadd.f32 %v1399_v47, %v3322_v40  ;;  %v1571_v55 = vpack.c.bf16 %v1551_v46, %v1549_v52  ;;  %v1511_v61 = vadd.f32 %v1510_v44, %v1398_v20 }
 0x1f9   : > { %v1401_v53 = vpop.f32.mrf.mxu0  ;;  %v1514_v19 = vpop.f32.mrf.mxu1 }
 0x1fa   : > { %v1572_v22 = vpack.c.bf16 %v1552_v50, %v1550_v49  ;;  %v1402_v54 = vadd.f32 %v1401_v53, %v3326_v41  ;;  %v1513_v58 = vadd.f32 %v1512_v48, %v1400_v51  ;;  %v1553_v8 = vmax.f32 %v1511_v61, 0.0 }
 0x1fb   : > { %v1403_v56 = vpop.f32.mrf.mxu0  ;;  %v1516_v57 = vpop.f32.mrf.mxu1 }
 0x1fc   : > { %v1515_v59 = vadd.f32 %v1514_v19, %v1402_v54  ;;  %v1404_v60 = vadd.f32 %v1403_v56, %v3322_v40  ;;  %1784 = vmatprep.mubr.bf16.mxu0 %v1572_v22  ;;  %v1554_v5 = vmax.f32 %v1513_v58, 0.0 }
 0x1fd   : > { %v1407_v62 = vpop.f32.mrf.mxu0  ;;  %v1520_v63 = vpop.f32.mrf.mxu1  ;;  %1785 = vmatmul.mubr.bf16.gmra.mxu0 %v1571_v55 }
 0x1fe   : > { %v1517_v1 = vadd.f32 %v1516_v57, %v1404_v60  ;;  %v1555_v2 = vmax.f32 %v1515_v59, 0.0  ;;  %v1408_v9 = vadd.f32 %v1407_v62, %v3326_v41 }
 0x1ff   : > { %v1409_v3 = vpop.f32.mrf.mxu0  ;;  %v1522_v4 = vpop.f32.mrf.mxu1 }
 0x200   : > { %v1556_v6 = vmax.f32 %v1517_v1, 0.0  ;;  %v1410_v7 = vadd.f32 %v1409_v3, %v3322_v40  ;;  %v1573_v13 = vpack.c.bf16 %v1555_v2, %v1553_v8  ;;  %v1521_v18 = vadd.f32 %v1520_v63, %v1408_v9 }
 0x201   : > { %v1411_v0 = vpop.f32.mrf.mxu0  ;;  %v1524_v10 = vpop.f32.mrf.mxu1 }
 0x202   : > { %v1574_v11 = vpack.c.bf16 %v1556_v6, %v1554_v5  ;;  %v1412_v12 = vadd.f32 %v1411_v0, %v3326_v41  ;;  %v1523_v15 = vadd.f32 %v1522_v4, %v1410_v7  ;;  %v1557_v31 = vmax.f32 %v1521_v18, 0.0  ;;  %v2878_v41 = vld [vmem:[%s3523_s7 + $0x20] sm:$0xff]  }
 0x203   : > { %v1413_v14 = vpop.f32.mrf.mxu0  ;;  %v1526_v21 = vpop.f32.mrf.mxu1  ;;  %2625 = vmatprep.subr.bf16.mxu1 %v2878_v41 }
 0x204   : > { %v1525_v16 = vadd.f32 %v1524_v10, %v1412_v12  ;;  %v1414_v17 = vadd.f32 %v1413_v14, %v3322_v40  ;;  %1792 = vmatprep.mubr.bf16.mxu0 %v1574_v11  ;;  %v1558_v25 = vmax.f32 %v1523_v15, 0.0  ;;  %2626 = vmatpush3.bf16.msra.mxu1 %v2878_v41  ;;  %v2879_v40 = vld [vmem:[%s3523_s7 + $0x18] sm:$0xff]  }
 0x205   : > { %1793 = vmatmul.mubr.bf16.gmra.mxu0 %v1573_v13  ;;  %2627 = vmatprep.subr.bf16.mxu1 %v2879_v40 }
 0x206   : > { %v1527_v23 = vadd.f32 %v1526_v21, %v1414_v17  ;;  %v1559_v24 = vmax.f32 %v1525_v16, 0.0 }
 0x208   : > { %v1560_v26 = vmax.f32 %v1527_v23, 0.0  ;;  %v1575_v29 = vpack.c.bf16 %v1559_v24, %v1557_v31  ;;  %2628 = vmatpush3.bf16.msra.mxu1 %v2879_v40 }
 0x209   : > { %2629 = vmatprep.subr.bf16.mxu1 %v2880_v33 }
 0x20a   : > { %v1576_v32 = vpack.c.bf16 %v1560_v26, %v1558_v25 }
 0x20c   : > { %1800 = vmatprep.mubr.bf16.mxu0 %v1576_v32  ;;  %2630 = vmatpush3.bf16.msra.mxu1 %v2880_v33 }
 0x20d   : > { %1801 = vmatmul.mubr.bf16.gmra.mxu0 %v1575_v29  ;;  %2631 = vmatprep.subr.bf16.mxu1 %v2881_v30 }
 0x210   : > { %2632 = vmatpush3.bf16.msra.mxu1 %v2881_v30 }
 0x211   : > { %2633 = vmatprep.subr.bf16.mxu1 %v2882_v27 }
 0x214   : > { %2634 = vmatpush3.bf16.msra.mxu1 %v2882_v27 }
 0x215   : > { %2651 = vmatprep.subr.bf16.mxu1 %v2883_v28 }
 0x295   : > { %v2534_v34 = vpop.f32.mrf.mxu0 }
 0x297   : > { %v2535_v35 = vpop.f32.mrf.mxu0 }
 0x298   : > { %v2536_v36 = vadd.f32 %v2535_v35, %v2534_v34 }
 0x299   : > { %v2537_v38 = vpop.f32.mrf.mxu0 }
 0x29a   : > { %v1747_v42 = vadd.f32 %v2536_v36, %v3381_v37 }
 0x29b   : > { %v2538_v39 = vpop.f32.mrf.mxu0 }
 0x29c   : > { %v2539_v43 = vadd.f32 %v2538_v39, %v2537_v38  ;;  %v1809_v47 = vmax.f32 %v1747_v42, 0.0 }
 0x29d   : > { %v2540_v44 = vpop.f32.mrf.mxu0 }
 0x29e   : > { %v1750_v45 = vadd.f32 %v2539_v43, %v3381_v37 }
 0x29f   : > { %v2541_v46 = vpop.f32.mrf.mxu0 }
 0x2a0   : > { %v1810_v48 = vmax.f32 %v1750_v45, 0.0  ;;  %v2542_v49 = vadd.f32 %v2541_v46, %v2540_v44 }
 0x2a1   : > { %v2543_v50 = vpop.f32.mrf.mxu0 }
 0x2a2   : > { %v1825_v51 = vpack.c.bf16 %v1810_v48, %v1809_v47  ;;  %v1755_v20 = vadd.f32 %v2542_v49, %v3381_v37 }
 0x2a3   : > { %v2544_v52 = vpop.f32.mrf.mxu0 }
 0x2a4   : > { %v2545_v53 = vadd.f32 %v2544_v52, %v2543_v50  ;;  %2635 = vmatprep.mubr.bf16.mxu1 %v1825_v51  ;;  %v1811_v55 = vmax.f32 %v1755_v20, 0.0 }
 0x2a5   : > { %v2546_v19 = vpop.f32.mrf.mxu0 }
 0x2a6   : > { %v1758_v22 = vadd.f32 %v2545_v53, %v3381_v37 }
 0x2a7   : > { %v2547_v54 = vpop.f32.mrf.mxu0 }
 0x2a8   : > { %v1812_v56 = vmax.f32 %v1758_v22, 0.0  ;;  %v2548_v57 = vadd.f32 %v2547_v54, %v2546_v19 }
 0x2a9   : > { %v2549_v58 = vpop.f32.mrf.mxu0 }
 0x2aa   : > { %v1826_v59 = vpack.c.bf16 %v1812_v56, %v1811_v55  ;;  %v1763_v61 = vadd.f32 %v2548_v57, %v3381_v37 }
 0x2ab   : > { %v2550_v60 = vpop.f32.mrf.mxu0 }
 0x2ac   : > { %v2551_v62 = vadd.f32 %v2550_v60, %v2549_v58  ;;  %2636 = vmatmul.mubr.bf16.vlgmr.msra.gmra.mxu1 %v1826_v59  ;;  %v1813_v3 = vmax.f32 %v1763_v61, 0.0  ;;  %v2884_v59 = vld [vmem:[%s3525_s9 + $0x10] sm:$0xff]   ;;  %v2885_v60 = vld [vmem:[%s3525_s9 + $0x8] sm:$0xff]  }
 0x2ad   : > { %v2552_v63 = vpop.f32.mrf.mxu0  ;;  %2652 = vmatpush3.bf16.msra.mxu1 %v2883_v28 }
 0x2ae   : > { %v1766_v1 = vadd.f32 %v2551_v62, %v3381_v37  ;;  %2653 = vmatprep.subr.bf16.mxu1 %v2884_v59 }
 0x2af   : > { %v2553_v2 = vpop.f32.mrf.mxu0 }
 0x2b0   : > { %v1814_v4 = vmax.f32 %v1766_v1, 0.0  ;;  %v2554_v5 = vadd.f32 %v2553_v2, %v2552_v63  ;;  %v2491_v63 = vld [vmem:[%s3524_s8] ss:$0 sm:$0xff] }
 0x2b1   : > { %v2555_v6 = vpop.f32.mrf.mxu0  ;;  %2654 = vmatpush3.bf16.msra.mxu1 %v2884_v59 }
 0x2b2   : > { %v1827_v7 = vpack.c.bf16 %v1814_v4, %v1813_v3  ;;  %v1771_v9 = vadd.f32 %v2554_v5, %v3381_v37  ;;  %2655 = vmatprep.subr.bf16.mxu1 %v2885_v60 }
 0x2b3   : > { %v2556_v8 = vpop.f32.mrf.mxu0 }
 0x2b4   : > { %v2557_v0 = vadd.f32 %v2556_v8, %v2555_v6  ;;  %2639 = vmatprep.mubr.bf16.mxu1 %v1827_v7  ;;  %v1815_v13 = vmax.f32 %v1771_v9, 0.0 }
 0x2b5   : > { %v2558_v10 = vpop.f32.mrf.mxu0  ;;  %2656 = vmatpush3.bf16.msra.mxu1 %v2885_v60 }
 0x2b6   : > { %v1774_v11 = vadd.f32 %v2557_v0, %v3381_v37 }
 0x2b7   : > { %v2559_v12 = vpop.f32.mrf.mxu0 }
 0x2b8   : > { %v1816_v14 = vmax.f32 %v1774_v11, 0.0  ;;  %v2560_v15 = vadd.f32 %v2559_v12, %v2558_v10 }
 0x2b9   : > { %v2561_v16 = vpop.f32.mrf.mxu0 }
 0x2ba   : > { %v1828_v17 = vpack.c.bf16 %v1816_v14, %v1815_v13  ;;  %v1779_v21 = vadd.f32 %v2560_v15, %v3381_v37 }
 0x2bb   : > { %v2562_v18 = vpop.f32.mrf.mxu0 }
 0x2bc   : > { %v2563_v23 = vadd.f32 %v2562_v18, %v2561_v16  ;;  %2640 = vmatmul.mubr.bf16.gmra.mxu1 %v1828_v17  ;;  %v1817_v31 = vmax.f32 %v1779_v21, 0.0 }
 0x2bd   : > { %v2564_v24 = vpop.f32.mrf.mxu0 }
 0x2be   : > { %v1782_v25 = vadd.f32 %v2563_v23, %v3381_v37 }
 0x2bf   : > { %v2565_v26 = vpop.f32.mrf.mxu0 }
 0x2c0   : > { %v1818_v32 = vmax.f32 %v1782_v25, 0.0  ;;  %v2566_v29 = vadd.f32 %v2565_v26, %v2564_v24 }
 0x2c1   : > { %v2567_v41 = vpop.f32.mrf.mxu0 }
 0x2c2   : > { %v1829_v40 = vpack.c.bf16 %v1818_v32, %v1817_v31  ;;  %v1787_v30 = vadd.f32 %v2566_v29, %v3381_v37 }
 0x2c3   : > { %v2568_v33 = vpop.f32.mrf.mxu0 }
 0x2c4   : > { %v2569_v27 = vadd.f32 %v2568_v33, %v2567_v41  ;;  %2643 = vmatprep.mubr.bf16.mxu1 %v1829_v40  ;;  %v1819_v36 = vmax.f32 %v1787_v30, 0.0 }
 0x2c5   : > { %v2570_v28 = vpop.f32.mrf.mxu0 }
 0x2c6   : > { %v1790_v34 = vadd.f32 %v2569_v27, %v3381_v37 }
 0x2c7   : > { %v2571_v35 = vpop.f32.mrf.mxu0 }
 0x2c8   : > { %v1820_v38 = vmax.f32 %v1790_v34, 0.0  ;;  %v2572_v39 = vadd.f32 %v2571_v35, %v2570_v28 }
 0x2c9   : > { %v2573_v42 = vpop.f32.mrf.mxu0 }
 0x2ca   : > { %v1830_v43 = vpack.c.bf16 %v1820_v38, %v1819_v36  ;;  %v1795_v45 = vadd.f32 %v2572_v39, %v3381_v37 }
 0x2cb   : > { %v2574_v44 = vpop.f32.mrf.mxu0 }
 0x2cc   : > { %v2575_v46 = vadd.f32 %v2574_v44, %v2573_v42  ;;  %2644 = vmatmul.mubr.bf16.gmra.mxu1 %v1830_v43  ;;  %v1821_v50 = vmax.f32 %v1795_v45, 0.0 }
 0x2cd   : > { %v2576_v47 = vpop.f32.mrf.mxu0 }
 0x2ce   : > { %v1798_v48 = vadd.f32 %v2575_v46, %v3381_v37 }
 0x2cf   : > { %v2577_v49 = vpop.f32.mrf.mxu0 }
 0x2d0   : > { %v1822_v51 = vmax.f32 %v1798_v48, 0.0  ;;  %v2578_v52 = vadd.f32 %v2577_v49, %v2576_v47 }
 0x2d1   : > { %v2579_v20 = vpop.f32.mrf.mxu0 }
 0x2d2   : > { %v1831_v53 = vpack.c.bf16 %v1822_v51, %v1821_v50  ;;  %v1803_v22 = vadd.f32 %v2578_v52, %v3381_v37 }
 0x2d3   : > { %v2580_v19 = vpop.f32.mrf.mxu0 }
 0x2d4   : > { %v2581_v54 = vadd.f32 %v2580_v19, %v2579_v20  ;;  %2647 = vmatprep.mubr.bf16.mxu1 %v1831_v53  ;;  %v1823_v56 = vmax.f32 %v1803_v22, 0.0 }
 0x2d6   : > { %v1806_v55 = vadd.f32 %v2581_v54, %v3381_v37  ;;  %v2886_v37 = vld [vmem:[%s3525_s9] sm:$0xff]  }
 0x2d7   : > { %2657 = vmatprep.subr.bf16.mxu1 %v2886_v37 }
 0x2d8   : > { %v1824_v57 = vmax.f32 %v1806_v55, 0.0  ;;  %2658 = vmatpush3.bf16.msra.mxu1 %v2886_v37  ;;  %v2983_v55 = vmov 0.0  }
 0x2d9   : > { %2675 = vmatprep.subr.bf16.mxu0 %v2983_v55  ;;  %2691 = vmatprep.mubr.msk.bf16.mxu0 %vm2984_vm3, %v2983_v55 }
 0x2da   : > { %v1832_v58 = vpack.c.bf16 %v1824_v57, %v1823_v56  ;;  %v2211_v56 = vld [vmem:[%s3528_s12] sm:$0xff] }
 0x2db   : > { %2214 = vperm.xlu0 %2750, %v2211_v56  }
 0x2dc   : > { %2648 = vmatmul.mubr.bf16.gmra.mxu1 %v1832_v58  ;;  %v3427_v58 = vld [vmem:[%s3526_s10] ss:$0 sm:$0xff] }
 0x36c   : > { %v2637_v61 = vpop.f32.mrf.mxu1 }
 0x36d   : > { %v1947_v4 = vadd.f32 %v2637_v61, %v2491_v63 }
 0x36e   : > { %v1938_v62 = vpop.f32.mrf.mxu1 }
 0x36f   : > { %v1939_v2 = vadd.f32 %v2491_v63, %v1938_v62  ;;  %v2003_v0 = vmax.f32 %v1947_v4, 0.0 }
 0x370   : > { %v2638_v1 = vpop.f32.mrf.mxu1 }
 0x371   : > { %v1950_v3 = vadd.f32 %v2638_v1, %v2491_v63  ;;  %v2001_v8 = vmax.f32 %v1939_v2, 0.0 }
 0x372   : > { %v1941_v5 = vpop.f32.mrf.mxu1 }
 0x373   : > { %v1942_v6 = vadd.f32 %v2491_v63, %v1941_v5  ;;  %v2004_v7 = vmax.f32 %v1950_v3, 0.0 }
 0x375   : > { %v2002_v9 = vmax.f32 %v1942_v6, 0.0  ;;  %v2018_v11 = vpack.c.bf16 %v2004_v7, %v2003_v0 }
 0x377   : > { %v2017_v10 = vpack.c.bf16 %v2002_v9, %v2001_v8 }
 0x379   : > { %2659 = vmatprep.mubr.msk.bf16.mxu1 %vm2064_vm2, %v2017_v10 }
 0x37a   : > { %2660 = vmatmul.mubr.msk.bf16.vlgmr.msra.gmra.mxu1 %vm2064_vm2, %v2018_v11 }
 0x37c   : > { %v2641_v12 = vpop.f32.mrf.mxu1 }
 0x37d   : > { %v1963_v17 = vadd.f32 %v2641_v12, %v2491_v63 }
 0x37e   : > { %v1954_v13 = vpop.f32.mrf.mxu1 }
 0x37f   : > { %v1955_v15 = vadd.f32 %v2491_v63, %v1954_v13  ;;  %v2007_v26 = vmax.f32 %v1963_v17, 0.0 }
 0x380   : > { %v2642_v14 = vpop.f32.mrf.mxu1 }
 0x381   : > { %v1966_v16 = vadd.f32 %v2642_v14, %v2491_v63  ;;  %v2005_v24 = vmax.f32 %v1955_v15, 0.0 }
 0x382   : > { %v1957_v18 = vpop.f32.mrf.mxu1 }
 0x383   : > { %v1958_v21 = vadd.f32 %v2491_v63, %v1957_v18  ;;  %v2008_v23 = vmax.f32 %v1966_v16, 0.0 }
 0x385   : > { %v2006_v25 = vmax.f32 %v1958_v21, 0.0  ;;  %v2020_v32 = vpack.c.bf16 %v2008_v23, %v2007_v26 }
 0x387   : > { %v2019_v31 = vpack.c.bf16 %v2006_v25, %v2005_v24 }
 0x389   : > { %2663 = vmatprep.mubr.msk.bf16.mxu1 %vm2064_vm2, %v2019_v31 }
 0x38a   : > { %2664 = vmatmul.mubr.msk.bf16.gmra.mxu1 %vm2064_vm2, %v2020_v32 }
 0x38c   : > { %v2645_v29 = vpop.f32.mrf.mxu1 }
 0x38d   : > { %v1979_v27 = vadd.f32 %v2645_v29, %v2491_v63 }
 0x38e   : > { %v1970_v41 = vpop.f32.mrf.mxu1 }
 0x38f   : > { %v1971_v33 = vadd.f32 %v2491_v63, %v1970_v41  ;;  %v2011_v39 = vmax.f32 %v1979_v27, 0.0 }
 0x390   : > { %v2646_v40 = vpop.f32.mrf.mxu1 }
 0x391   : > { %v1982_v30 = vadd.f32 %v2646_v40, %v2491_v63  ;;  %v2009_v36 = vmax.f32 %v1971_v33, 0.0 }
 0x392   : > { %v1973_v28 = vpop.f32.mrf.mxu1 }
 0x393   : > { %v1974_v34 = vadd.f32 %v2491_v63, %v1973_v28  ;;  %v2012_v35 = vmax.f32 %v1982_v30, 0.0 }
 0x395   : > { %v2010_v38 = vmax.f32 %v1974_v34, 0.0  ;;  %v2022_v43 = vpack.c.bf16 %v2012_v35, %v2011_v39 }
 0x397   : > { %v2021_v42 = vpack.c.bf16 %v2010_v38, %v2009_v36 }
 0x399   : > { %2667 = vmatprep.mubr.msk.bf16.mxu1 %vm2064_vm2, %v2021_v42 }
 0x39a   : > { %2668 = vmatmul.mubr.msk.bf16.gmra.mxu1 %vm2064_vm2, %v2022_v43 }
 0x39c   : > { %v2649_v44 = vpop.f32.mrf.mxu1 }
 0x39d   : > { %v1995_v49 = vadd.f32 %v2649_v44, %v2491_v63 }
 0x39e   : > { %v1986_v45 = vpop.f32.mrf.mxu1 }
 0x39f   : > { %v1987_v47 = vadd.f32 %v2491_v63, %v1986_v45  ;;  %v2015_v19 = vmax.f32 %v1995_v49, 0.0 }
 0x3a0   : > { %v2650_v46 = vpop.f32.mrf.mxu1 }
 0x3a1   : > { %v1998_v48 = vadd.f32 %v2650_v46, %v2491_v63  ;;  %v2013_v20 = vmax.f32 %v1987_v47, 0.0 }
 0x3a2   : > { %v1989_v50 = vpop.f32.mrf.mxu1 }
 0x3a3   : > { %v1990_v51 = vadd.f32 %v2491_v63, %v1989_v50  ;;  %v2016_v52 = vmax.f32 %v1998_v48, 0.0 }
 0x3a5   : > { %v2014_v53 = vmax.f32 %v1990_v51, 0.0  ;;  %v2024_v54 = vpack.c.bf16 %v2016_v52, %v2015_v19 }
 0x3a7   : > { %v2023_v22 = vpack.c.bf16 %v2014_v53, %v2013_v20 }
 0x3a9   : > { %2671 = vmatprep.mubr.msk.bf16.mxu1 %vm2064_vm2, %v2023_v22 }
 0x3aa   : > { %2672 = vmatmul.mubr.msk.bf16.gmra.mxu1 %vm2064_vm2, %v2024_v54 }
 0x43a   : > { %v2661_v57 = vpop.f32.mrf.mxu1 }
 0x43b   : > { %v2132_v60 = vadd.f32 %v2661_v57, %v3427_v58 }
 0x43c   : > { %v2123_v59 = vpop.f32.mrf.mxu1 }
 0x43d   : > { %v2124_v61 = vadd.f32 %v3427_v58, %v2123_v59  ;;  %v2188_v1 = vmax.f32 %v2132_v60, 0.0  ;;  %v2210_v59 = vld [vmem:[%s3527_s11] sm:$0xf]  ;;  %v2215_v60 = vpop.permute.xlu0 %2214 }
 0x43e   : > { %v2662_v37 = vpop.f32.mrf.mxu1 }
 0x43f   : > { %v2135_v62 = vadd.f32 %v2662_v37, %v3427_v58  ;;  %v2186_v4 = vmax.f32 %v2124_v61, 0.0 }
 0x440   : > { %v2126_v63 = vpop.f32.mrf.mxu1 }
 0x441   : > { %v2189_v2 = vmax.f32 %v2135_v62, 0.0  ;;  %v2127_v3 = vadd.f32 %v3427_v58, %v2126_v63 }
 0x443   : > { %v3433_v5 = vpack.c.bf16 %v2189_v2, %v2188_v1  ;;  %v2187_v6 = vmax.f32 %v2127_v3, 0.0 }
 0x445   : > { %v3435_v7 = vpack.c.bf16 %v2187_v6, %v2186_v4  ;;  %v2225_v57 = vsel %vm2217_vm4, %v3433_v5, 0 }
 0x44a   : > { %v2665_v8 = vpop.f32.mrf.mxu1 }
 0x44b   : > { %v2148_v47 = vadd.f32 %v2665_v8, %v3427_v58 }
 0x44c   : > { %v2139_v9 = vpop.f32.mrf.mxu1 }
 0x44d   : > { %v2192_v50 = vmax.f32 %v2148_v47, 0.0  ;;  %v2140_v20 = vadd.f32 %v3427_v58, %v2139_v9 }
 0x44e   : > { %v2666_v0 = vpop.f32.mrf.mxu1 }
 0x44f   : > { %v2151_v45 = vadd.f32 %v2666_v0, %v3427_v58  ;;  %v2190_v22 = vmax.f32 %v2140_v20, 0.0 }
 0x450   : > { %v2142_v10 = vpop.f32.mrf.mxu1 }
 0x451   : > { %v2193_v48 = vmax.f32 %v2151_v45, 0.0  ;;  %v2143_v52 = vadd.f32 %v3427_v58, %v2142_v10 }
 0x453   : > { %v2205_v51 = vpack.c.bf16 %v2193_v48, %v2192_v50  ;;  %v2191_v53 = vmax.f32 %v2143_v52, 0.0 }
 0x455   : > { %v2231_v19 = vsel %vm2217_vm4, %v2205_v51, 0  ;;  %v2204_v54 = vpack.c.bf16 %v2191_v53, %v2190_v22 }
 0x457   : > { %v2228_v56 = vsel %vm2217_vm4, %v2204_v54, 0 }
 0x45a   : > { %v2669_v11 = vpop.f32.mrf.mxu1 }
 0x45b   : > { %v2164_v27 = vadd.f32 %v2669_v11, %v3427_v58 }
 0x45c   : > { %v2155_v12 = vpop.f32.mrf.mxu1 }
 0x45d   : > { %v2196_v35 = vmax.f32 %v2164_v27, 0.0  ;;  %v2156_v39 = vadd.f32 %v3427_v58, %v2155_v12 }
 0x45e   : > { %v2670_v13 = vpop.f32.mrf.mxu1 }
 0x45f   : > { %v2167_v33 = vadd.f32 %v2670_v13, %v3427_v58  ;;  %v2194_v44 = vmax.f32 %v2156_v39, 0.0 }
 0x460   : > { %v2158_v14 = vpop.f32.mrf.mxu1 }
 0x461   : > { %v2197_v28 = vmax.f32 %v2167_v33, 0.0  ;;  %v2159_v38 = vadd.f32 %v3427_v58, %v2158_v14 }
 0x463   : > { %v2207_v36 = vpack.c.bf16 %v2197_v28, %v2196_v35  ;;  %v2195_v42 = vmax.f32 %v2159_v38, 0.0 }
 0x465   : > { %v2237_v43 = vsel %vm2217_vm4, %v2207_v36, 0  ;;  %v2206_v46 = vpack.c.bf16 %v2195_v42, %v2194_v44 }
 0x467   : > { %v2234_v49 = vsel %vm2217_vm4, %v2206_v46, 0 }
 0x46a   : > { %v2673_v15 = vpop.f32.mrf.mxu1 }
 0x46b   : > { %v2180_v17 = vadd.f32 %v2673_v15, %v3427_v58 }
 0x46c   : > { %v2171_v16 = vpop.f32.mrf.mxu1 }
 0x46d   : > { %v2200_v24 = vmax.f32 %v2180_v17, 0.0  ;;  %v2172_v31 = vadd.f32 %v3427_v58, %v2171_v16 }
 0x46e   : > { %v2674_v18 = vpop.f32.mrf.mxu1 }
 0x46f   : > { %v2183_v21 = vadd.f32 %v2674_v18, %v3427_v58  ;;  %v2198_v40 = vmax.f32 %v2172_v31, 0.0 }
 0x470   : > { %v2174_v23 = vpop.f32.mrf.mxu1 }
 0x471   : > { %v2201_v25 = vmax.f32 %v2183_v21, 0.0  ;;  %v2175_v26 = vadd.f32 %v3427_v58, %v2174_v23  ;;  %v2222_v58 = vsel %vm2217_vm4, %v3435_v7, 0 }
 0x473   : > { %v2209_v32 = vpack.c.bf16 %v2201_v25, %v2200_v24  ;;  %v2199_v29 = vmax.f32 %v2175_v26, 0.0 }
 0x475   : > { %v2243_v41 = vsel %vm2217_vm4, %v2209_v32, 0  ;;  %v2208_v30 = vpack.c.bf16 %v2199_v29, %v2198_v40 }
 0x476   : > { %2676 = vmatpush3.bf16.xpose.msra.mxu0 %v2243_v41 }
 0x477   : > { %2677 = vmatprep.subr.bf16.mxu0 %v2983_v55  ;;  %v2240_v34 = vsel %vm2217_vm4, %v2208_v30, 0 }
 0x47e   : > { %2678 = vmatpush3.bf16.xpose.msra.mxu0 %v2240_v34 }
 0x47f   : > { %2679 = vmatprep.subr.bf16.mxu0 %v2983_v55 }
 0x486   : > { %2680 = vmatpush3.bf16.xpose.msra.mxu0 %v2237_v43 }
 0x487   : > { %2681 = vmatprep.subr.bf16.mxu0 %v2983_v55 }
 0x48e   : > { %2682 = vmatpush3.bf16.xpose.msra.mxu0 %v2234_v49 }
 0x48f   : > { %2683 = vmatprep.subr.bf16.mxu0 %v2983_v55 }
 0x496   : > { %2684 = vmatpush3.bf16.xpose.msra.mxu0 %v2231_v19 }
 0x497   : > { %2685 = vmatprep.subr.bf16.mxu0 %v2983_v55 }
 0x49e   : > { %2686 = vmatpush3.bf16.xpose.msra.mxu0 %v2228_v56 }
 0x49f   : > { %2687 = vmatprep.subr.bf16.mxu0 %v2983_v55 }
 0x4a6   : > { %2688 = vmatpush3.bf16.xpose.msra.mxu0 %v2225_v57 }
 0x4a7   : > { %2689 = vmatprep.subr.bf16.mxu0 %v2983_v55 }
 0x4ae   : > { %2690 = vmatpush3.bf16.xpose.msra.mxu0 %v2222_v58 }
 0x4b5   : > { %2692 = vmatmul.mubr.msk.bf16.vlgmr.msra.gmra.mxu0 %vm2217_vm4, %v2210_v59 }
 0x575   : > { %v2279_v37 = vpop.f32.mrf.mxu0 }
 0x576   : > { %v2280_v61 = vadd.f32 %v2279_v37, %v2215_v60 }
 0x577   : > { %v2693_v55 = vpop.f32.mrf.mxu0 }
 0x578   : > { %2285 = vst [vmem:[%s449_s24] sm:$0xff] %v2280_v61 }
 0x579   : > { %v2282_v62 = vpop.f32.mrf.mxu0 }
 0x57a   : > { %2926 = shalt.err (!%p2923_p0)
}
 0x57b   : > { %s2927_s0 = scalar_lea.hbm %s3475_s3, 128  ;;  %s2931_s16 = scalar_lea.hbm %s3529_s13, 256 }
 0x57c   : > { %p2928_p1 = scmp.ne.s32.totalorder %s3475_s3, %s2927_s0  ;;  %p2932_p4 = scmp.lt.s32.totalorder %s3475_s3, %s3529_s13 }
 0x57d   : > { %p2933_p7 = scmp.lt.s32.totalorder %s2931_s16, %s2927_s0 }
 0x57e   : > { %p2929_p2 = pnand %p2928_p1, %p3094_p5 }
 0x57f   : > { %p2934_p6 = por %p2933_p7, %p2932_p4 }
 0x580   : > { %p2930_p3 = pneg %p2929_p2 }
 0x582   : > { %p2935_p8 = pnand %p2934_p6, %p2930_p3 }
 0x584   : > { %2938 = shalt.err (!%p2935_p8)
}
 0x585   : > { %2699 = dma.vmem_to_hbm [thread:$0]  (%p3094_p5), %s3477_s30, 128, %s3475_s3, %s2287_s21   ;;  %v2694_v63 = vpop.f32.mrf.mxu0 }
 0x586 PF: > { %p2711_p9 = scmp.ge.s32.totalorder %s2977_s28, 2  ;;  %s2312_s22 = sand.u32 1, %s2965_s25  }
 0x587   : > { %p3539_p10 = scmp.ne.s32.totalorder %s3534_s19, 0  ;;  %s2313_s1 = scalar_lea.sflag [#allocation4], %s2312_s22 }
 0x589   : > { %p2706_p11 = pnand %p2711_p9, %p3539_p10 }
 0x58b   : > { %p2707_p12 = pneg %p2706_p11 }
 0x58d   : > { %2960 = dma.done.wait (%p2707_p12), %s2313_s1, 128  }
 0x58e   : > { %2962 = vsyncadd (%p2707_p12), %s2313_s1, 4294967168  ;;  %p24_p13 = scmp.ge.s32.totalorder %s3081_s14, 4   ;;  %s3540_s25 = smov %s2969_s26 }
 0x58f   : > { %s3541_s26 = smov %s2973_s27  ;;  %s3542_s27 = smov %s3092_s17 }
 0x590   : > { %s3543_s28 = smov %s3081_s14  ;;  %26 = sbr.rel (!%p24_p13) target bundleno = 8 (0x8), region = 112 }
 0x595   :  { %2318 = vsyncpa [#allocation3], 1 }
 0x596   :  { %2320 = vsyncpa [#allocation3 + $0x1], 1 }
 0x597   :  { %2321 = vsyncpa [#allocation4], 1 }
 0x598   :  { %2323 = vsyncpa [#allocation4 + $0x1], 1 }

</bundles_post_ra>
